<compile_context>
chip_gen: v5e
topology: v5e:2x2
jax: 0.10.0
libtpu: 0.0.40
codegen_flags: <defaults>
</compile_context>

<pallas_src>
import math
import functools

import jax
import jax.numpy as jnp
from jax import lax
from jax.experimental import pallas as pl
from jax.experimental.pallas import tpu as pltpu


def _lstm_block_kernel(gx_ref, whhT_ref, out_ref, hN_ref, cN_ref, gx_sc, out_sc):
    """One (direction, time-block) grid cell of the LSTM recurrence.

    gx_ref  : (1, TB, B, 4H) f32   precomputed x @ W_ih^T + b (gate order i,f,o,g)
    whhT_ref: (1, H, 4H)     bf16  recurrent weights, pre-transposed
    out_ref : (1, TB, B, H)  f32   per-step hidden states
    hN_ref / cN_ref : (1, B, H) f32, block-resident across the time axis (carry)
    gx_sc   : (TB, B, 4H) f32 scratch (staged, direction-ordered gate inputs)
    out_sc  : (TB, B, H)  f32 scratch (staged per-step outputs)
    """
    d = pl.program_id(0)          # direction axis (parallel / megacore)
    t = pl.program_id(1)          # time-block axis (sequential recurrence)

    TB, _, G = gx_sc.shape
    H = G // 4

    @pl.when(t == 0)
    def _():
        hN_ref[...] = jnp.zeros(hN_ref.shape, hN_ref.dtype)
        cN_ref[...] = jnp.zeros(cN_ref.shape, cN_ref.dtype)

    # Stage the gate-input block.  The backward direction reverses the rows ONCE here
    # with all-static addressing, keeping dynamic indices off the per-step chain.
    @pl.when(d == 0)
    def _():
        gx_sc[...] = gx_ref[0]

    @pl.when(d != 0)
    def _():
        for j in range(TB):
            gx_sc[j] = gx_ref[0, TB - 1 - j]

    whhT = whhT_ref[0]            # (H, 4H) bf16
    h = hN_ref[0]                 # carry lives in the block-resident output refs
    c = cN_ref[0]
    for j in range(TB):           # static indices throughout the recurrence
        gates = gx_sc[j] + jnp.dot(h.astype(whhT.dtype), whhT,
                                   preferred_element_type=jnp.float32)
        sig = jax.nn.sigmoid(gates[:, :3 * H])     # i, f, o  (one EUP pass, 3H wide)
        g_g = jnp.tanh(gates[:, 3 * H:])           # g        (one EUP pass, H wide)
        i_g = sig[:, 0:H]
        f_g = sig[:, H:2 * H]
        o_g = sig[:, 2 * H:3 * H]
        c = f_g * c + i_g * g_g
        h = o_g * jnp.tanh(c)
        out_sc[j] = h
    hN_ref[0] = h
    cN_ref[0] = c

    # One bulk, static-address store per block; backward direction un-reverses rows.
    @pl.when(d == 0)
    def _():
        out_ref[0] = out_sc[...]

    @pl.when(d != 0)
    def _():
        for j in range(TB):
            out_ref[0, TB - 1 - j] = out_sc[j]


@functools.partial(jax.jit, static_argnames=("tb",))
def _lstm_layer(inp, w_ihT, w_hhT, b_sum, *, tb):
    """One LSTM layer, both directions fused into a single pallas_call.

    inp   : (P, T, B, F)   previous-layer activations (P=1, F=input_size for layer 0;
                           P=num_dirs, F=H afterwards) -- no inter-layer concat needed.
    w_ihT : (D, P, F, 4H)  input weights, transposed & gate-permuted, f32
    w_hhT : (D, H, 4H)     recurrent weights, transposed & gate-permuted, bf16
    b_sum : (D, 4H)        b_ih + b_hh, gate-permuted
    returns out (D, T, B, H), h_final (D, B, H), c_final (D, B, H)
    """
    P, T, B, F = inp.shape
    D, H, _ = w_hhT.shape
    assert T % tb == 0
    NT = T // tb

    # Input projection for the whole sequence & all directions: one big MXU-friendly
    # matmul hoisted off the serial recurrence.
    gx = (jnp.einsum("ptbf,dpfg->dtbg", inp, w_ihT,
                     preferred_element_type=jnp.float32)
          + b_sum[:, None, None, :]).astype(jnp.float32)          # (D, T, B, 4H)

    # Reverse direction handled by DMA addressing: d == 1 visits the time blocks
    # back-to-front (rows are reversed inside the kernel) -- no host [::-1] copies.
    def time_map(d, t):
        return (d, t + d * (NT - 1 - 2 * t), 0, 0)

    out, h_f, c_f = pl.pallas_call(
        _lstm_block_kernel,
        out_shape=(jax.ShapeDtypeStruct((D, T, B, H), jnp.float32),
                   jax.ShapeDtypeStruct((D, B, H), jnp.float32),
                   jax.ShapeDtypeStruct((D, B, H), jnp.float32)),
        grid_spec=pltpu.PrefetchScalarGridSpec(
            num_scalar_prefetch=0,
            grid=(D, NT),
            in_specs=[
                pl.BlockSpec((1, tb, B, 4 * H), time_map),             # gates_x block
                pl.BlockSpec((1, H, 4 * H), lambda d, t: (d, 0, 0)),   # W_hh^T (bf16)
            ],
            out_specs=(
                pl.BlockSpec((1, tb, B, H), time_map),                 # per-step h
                pl.BlockSpec((1, B, H), lambda d, t: (d, 0, 0)),       # final h (resident)
                pl.BlockSpec((1, B, H), lambda d, t: (d, 0, 0)),       # final c (resident)
            ),
            scratch_shapes=[pltpu.VMEM((tb, B, 4 * H), jnp.float32),   # staged gx
                            pltpu.VMEM((tb, B, H), jnp.float32)],      # staged out
        ),
        compiler_params=pltpu.CompilerParams(
            dimension_semantics=("parallel", "arbitrary"),
            vmem_limit_bytes=48 * 1024 * 1024),
    )(gx, w_hhT)
    return out, h_f, c_f


def _pick_time_block(T, B, H, budget_bytes=24 * 1024 * 1024, cap=32):
    """Largest time block (divisor of T, <= cap) whose VMEM working set fits the budget.

    Working set: pipelined gx/out blocks + staging scratches + bf16 W_hh buffers +
    h/c state blocks.  Budget targets v7x's 64 MiB physical VMEM with headroom;
    v5e/v6e (128 MiB) are strictly looser.
    """
    best = 1
    for tb in range(1, max(1, min(T, cap)) + 1):
        if T % tb:
            continue
        gx_blk = tb * B * 4 * H * 4          # f32
        out_blk = tb * B * H * 4             # f32
        whh = H * 4 * H * 2                  # bf16
        state = 2 * B * H * 4
        est = 3 * gx_blk + 3 * out_blk + 2 * whh + 2 * state
        if est <= budget_bytes:
            best = tb
    return best


def _permute_gates(w):
    """Reorder the trailing 4H gate axis from PyTorch (i, f, g, o) to (i, f, o, g)."""
    H = w.shape[-1] // 4
    return jnp.concatenate(
        [w[..., :2 * H], w[..., 3 * H:4 * H], w[..., 2 * H:3 * H]], axis=-1)


class PallasEncoder:
    """JAX/Pallas equivalent of the PyTorch Encoder (nn.LSTM, batch_first)."""

    def __init__(self, input_size, hidden_size, batch_size, num_layers,
                 bidirectional, dropout, key):
        self.input_size = input_size
        self.hidden_size = hidden_size
        self.batch_size = batch_size
        self.num_layers = num_layers
        self.bidirectional = bidirectional
        self.num_directions = 2 if bidirectional else 1
        self.dropout = dropout
        # TODO(synk): inter-layer dropout is skipped (eval-mode nn.LSTM semantics).

        k = 1.0 / math.sqrt(hidden_size)
        D = self.num_directions
        H = hidden_size
        # ref_params: PyTorch layout/gate order, f32 (for the pure-JAX reference).
        # kernel_params: gate-permuted, transposed, input-weights split per previous
        # direction, recurrent weights bf16.
        self.ref_params = []
        self.kernel_params = []
        for layer in range(num_layers):
            layer_in = input_size if layer == 0 else H * D
            w_ihT_d, w_hhT_d, b_d = [], [], []
            for _ in range(D):
                key, k1, k2, k3, k4 = jax.random.split(key, 5)
                w_ih = jax.random.uniform(k1, (4 * H, layer_in), jnp.float32, -k, k)
                w_hh = jax.random.uniform(k2, (4 * H, H), jnp.float32, -k, k)
                b_ih = jax.random.uniform(k3, (4 * H,), jnp.float32, -k, k)
                b_hh = jax.random.uniform(k4, (4 * H,), jnp.float32, -k, k)
                w_ihT_d.append(w_ih.T)            # (I, 4H)
                w_hhT_d.append(w_hh.T)            # (H, 4H)
                b_d.append(b_ih + b_hh)           # (4H,)
            w_ihT = jnp.stack(w_ihT_d)            # (D, I, 4H)
            w_hhT = jnp.stack(w_hhT_d)            # (D, H, 4H)
            b_sum = jnp.stack(b_d)                # (D, 4H)
            self.ref_params.append((w_ihT, w_hhT, b_sum))

            P, F = (1, input_size) if layer == 0 else (D, H)
            w_ihT_k = _permute_gates(w_ihT).reshape(D, P, F, 4 * H)
            w_hhT_k = _permute_gates(w_hhT).astype(jnp.bfloat16)
            b_k = _permute_gates(b_sum)
            self.kernel_params.append((w_ihT_k, w_hhT_k, b_k))

    def forward(self, x):
        """x: (B, T, input_size) float32, batch_first like the PyTorch module.

        Returns (output, (h_n, c_n)):
          output: (B, T, hidden_size * num_directions)
          h_n, c_n: (num_layers * num_directions, B, hidden_size)
        Initial hidden/cell state is zeros (init_hidden in the reference).
        """
        B, T, _ = x.shape
        H = self.hidden_size
        D = self.num_directions
        # Pad batch to the f32 sublane granularity (8): unmasked VPU/EUP ops & stores
        # in the recurrence; padded rows are sliced off on exit.
        Bp = ((B + 7) // 8) * 8
        if Bp != B:
            x = jnp.pad(x, ((0, Bp - B), (0, 0), (0, 0)))
        tb = _pick_time_block(T, Bp, H)

        inp = jnp.transpose(x, (1, 0, 2))[None]        # (1, T, Bp, I): time-major once
        h_list, c_list = [], []
        out = None
        for (w_ihT, w_hhT, b_sum) in self.kernel_params:
            out, h_f, c_f = _lstm_layer(inp, w_ihT, w_hhT, b_sum, tb=tb)
            inp = out                                   # (D, T, Bp, H) feeds next layer
            h_list.append(h_f)
            c_list.append(c_f)

        # Single relayout back to batch_first / feature-concat at the exit.
        output = jnp.transpose(out, (2, 1, 0, 3)).reshape(Bp, T, D * H)[:B]
        h_n = jnp.concatenate(h_list, axis=0)[:, :B]    # (L*D, B, H), layer-major order
        c_n = jnp.concatenate(c_list, axis=0)[:, :B]
        return output, (h_n, c_n)


def _reference_lstm(x, layer_params, num_directions, hidden_size):
    """Pure-JAX (lax.scan) reference with PyTorch nn.LSTM eval semantics (f32)."""
    B, _, _ = x.shape
    H = hidden_size
    layer_in = x
    h_list, c_list = [], []
    for (w_ihT, w_hhT, b) in layer_params:
        dir_outs = []
        for d in range(num_directions):
            xs = layer_in if d == 0 else layer_in[:, ::-1]

            def step(carry, x_t, d=d):
                h, c = carry
                g = x_t @ w_ihT[d] + h @ w_hhT[d] + b[d]
                i = jax.nn.sigmoid(g[:, 0:H])
                f = jax.nn.sigmoid(g[:, H:2 * H])
                gg = jnp.tanh(g[:, 2 * H:3 * H])
                o = jax.nn.sigmoid(g[:, 3 * H:4 * H])
                c2 = f * c + i * gg
                h2 = o * jnp.tanh(c2)
                return (h2, c2), h2

            init = (jnp.zeros((B, H), jnp.float32), jnp.zeros((B, H), jnp.float32))
            (hT, cT), out = lax.scan(step, init, jnp.transpose(xs, (1, 0, 2)))
            out = jnp.transpose(out, (1, 0, 2))
            if d == 1:
                out = out[:, ::-1]
            dir_outs.append(out)
            h_list.append(hT)
            c_list.append(cT)
        layer_in = jnp.concatenate(dir_outs, axis=-1)
    return layer_in, jnp.stack(h_list, 0), jnp.stack(c_list, 0)


if __name__ == "__main__":
    # Small shapes consistent with the module's forward.
    batch_size = 2
    seq_len = 8
    input_size = 16
    hidden_size = 32
    num_layers = 2
    bidirectional = True
    dropout = 0.0

    root = jax.random.PRNGKey(0)
    k_param, k_x = jax.random.split(root)

    enc = PallasEncoder(input_size, hidden_size, batch_size, num_layers,
                        bidirectional, dropout, k_param)

    x = jax.random.normal(k_x, (batch_size, seq_len, input_size), jnp.float32)

    output, (h_n, c_n) = enc.forward(x)
    jax.block_until_ready((output, h_n, c_n))

    num_dirs = 2 if bidirectional else 1
    assert output.shape == (batch_size, seq_len, hidden_size * num_dirs)
    assert h_n.shape == (num_layers * num_dirs, batch_size, hidden_size)
    assert c_n.shape == (num_layers * num_dirs, batch_size, hidden_size)
    assert bool(jnp.all(jnp.isfinite(output)))

    # Numerical check against a pure-JAX f32 lax.scan reference (PyTorch semantics).
    # Tolerance accounts for bf16 recurrent weights (f32 accumulation in the kernel).
    ref_out, ref_h, ref_c = _reference_lstm(x, enc.ref_params, num_dirs, hidden_size)
    assert bool(jnp.max(jnp.abs(output - ref_out)) < 2e-2)
    assert bool(jnp.max(jnp.abs(h_n - ref_h)) < 2e-2)
    assert bool(jnp.max(jnp.abs(c_n - ref_c)) < 2e-2)

    print("KERNEL_OK")
</pallas_src>

<mosaic_0001>
module attributes {stable_mosaic.version = 11 : i64} {
  func.func @_lstm_block_kernel(%arg0: i32, %arg1: i32, %arg2: memref<1x8x8x128xf32, #tpu.memory_space<vmem>>, %arg3: memref<1x32x128xbf16, #tpu.memory_space<vmem>>, %arg4: memref<1x8x8x32xf32, #tpu.memory_space<vmem>>, %arg5: memref<1x8x32xf32, #tpu.memory_space<vmem>>, %arg6: memref<1x8x32xf32, #tpu.memory_space<vmem>>, %arg7: memref<8x8x128xf32, #tpu.memory_space<vmem>>, %arg8: memref<8x8x32xf32, #tpu.memory_space<vmem>>) attributes {dimension_semantics = [#tpu.dimension_semantics<parallel>, #tpu.dimension_semantics<arbitrary>], iteration_bounds = array<i64: 2, 1>, scalar_prefetch = 0 : i64, scratch_operands = 2 : i64, tpu.core_type = #tpu.core_type<tc>, window_params = [{transform_indices = @transform_0, window_bounds = array<i64: 1, 8, 8, 128>}, {transform_indices = @transform_1, window_bounds = array<i64: 1, 32, 128>}, {transform_indices = @transform_2, window_bounds = array<i64: 1, 8, 8, 32>}, {transform_indices = @transform_3, window_bounds = array<i64: 1, 8, 32>}, {transform_indices = @transform_4, window_bounds = array<i64: 1, 8, 32>}]} {
    %c0_i32 = arith.constant 0 : i32
    %0 = arith.cmpi eq, %arg1, %c0_i32 : i32
    %1 = arith.extui %0 : i1 to i32
    %c0_i32_0 = arith.constant 0 : i32
    %2 = arith.cmpi ne, %1, %c0_i32_0 : i32
    scf.if %2 {
      %cst_79 = arith.constant 0.000000e+00 : f32
      %219 = vector.broadcast %cst_79 : f32 to vector<1x8x32xf32>
      %c0_80 = arith.constant 0 : index
      %c0_81 = arith.constant 0 : index
      %c0_82 = arith.constant 0 : index
      %220 = vector.load %arg5[%c0_80, %c0_81, %c0_82] : memref<1x8x32xf32, #tpu.memory_space<vmem>>, vector<1x8x32xf32>
      tpu.vector_store %arg5[%c0_80, %c0_81, %c0_82], %219 {strides = array<i32>} : memref<1x8x32xf32, #tpu.memory_space<vmem>>, vector<1x8x32xf32>,
      %cst_83 = arith.constant 0.000000e+00 : f32
      %221 = vector.broadcast %cst_83 : f32 to vector<1x8x32xf32>
      %c0_84 = arith.constant 0 : index
      %c0_85 = arith.constant 0 : index
      %c0_86 = arith.constant 0 : index
      %222 = vector.load %arg6[%c0_84, %c0_85, %c0_86] : memref<1x8x32xf32, #tpu.memory_space<vmem>>, vector<1x8x32xf32>
      tpu.vector_store %arg6[%c0_84, %c0_85, %c0_86], %221 {strides = array<i32>} : memref<1x8x32xf32, #tpu.memory_space<vmem>>, vector<1x8x32xf32>,
    } else {
    }
    %c0_i32_1 = arith.constant 0 : i32
    %3 = arith.cmpi eq, %arg0, %c0_i32_1 : i32
    %4 = arith.extui %3 : i1 to i32
    %c0_i32_2 = arith.constant 0 : i32
    %5 = arith.cmpi ne, %4, %c0_i32_2 : i32
    scf.if %5 {
      %c0_79 = arith.constant 0 : index
      %c0_80 = arith.constant 0 : index
      %c0_81 = arith.constant 0 : index
      %c0_82 = arith.constant 0 : index
      %219 = vector.load %arg2[%c0_79, %c0_80, %c0_81, %c0_82] : memref<1x8x8x128xf32, #tpu.memory_space<vmem>>, vector<1x8x8x128xf32>
      %220 = vector.shape_cast %219 : vector<1x8x8x128xf32> to vector<8x8x128xf32>
      %c0_83 = arith.constant 0 : index
      %c0_84 = arith.constant 0 : index
      %c0_85 = arith.constant 0 : index
      %221 = vector.load %arg7[%c0_83, %c0_84, %c0_85] : memref<8x8x128xf32, #tpu.memory_space<vmem>>, vector<8x8x128xf32>
      tpu.vector_store %arg7[%c0_83, %c0_84, %c0_85], %220 {strides = array<i32>} : memref<8x8x128xf32, #tpu.memory_space<vmem>>, vector<8x8x128xf32>,
    } else {
    }
    %c0_i32_3 = arith.constant 0 : i32
    %6 = arith.cmpi ne, %arg0, %c0_i32_3 : i32
    %7 = arith.extui %6 : i1 to i32
    %c0_i32_4 = arith.constant 0 : i32
    %8 = arith.cmpi ne, %7, %c0_i32_4 : i32
    scf.if %8 {
      %c0_79 = arith.constant 0 : index
      %c7_80 = arith.constant 7 : index
      %c0_81 = arith.constant 0 : index
      %c0_82 = arith.constant 0 : index
      %219 = vector.load %arg2[%c0_79, %c7_80, %c0_81, %c0_82] : memref<1x8x8x128xf32, #tpu.memory_space<vmem>>, vector<1x1x8x128xf32>
      %220 = vector.shape_cast %219 : vector<1x1x8x128xf32> to vector<8x128xf32>
      %c0_83 = arith.constant 0 : index
      %c0_84 = arith.constant 0 : index
      %c0_85 = arith.constant 0 : index
      %221 = vector.load %arg7[%c0_83, %c0_84, %c0_85] : memref<8x8x128xf32, #tpu.memory_space<vmem>>, vector<1x8x128xf32>
      %222 = vector.shape_cast %221 : vector<1x8x128xf32> to vector<8x128xf32>
      %223 = vector.shape_cast %220 : vector<8x128xf32> to vector<1x8x128xf32>
      tpu.vector_store %arg7[%c0_83, %c0_84, %c0_85], %223 {strides = array<i32>} : memref<8x8x128xf32, #tpu.memory_space<vmem>>, vector<1x8x128xf32>,
      %c0_86 = arith.constant 0 : index
      %c6_87 = arith.constant 6 : index
      %c0_88 = arith.constant 0 : index
      %c0_89 = arith.constant 0 : index
      %224 = vector.load %arg2[%c0_86, %c6_87, %c0_88, %c0_89] : memref<1x8x8x128xf32, #tpu.memory_space<vmem>>, vector<1x1x8x128xf32>
      %225 = vector.shape_cast %224 : vector<1x1x8x128xf32> to vector<8x128xf32>
      %c1_90 = arith.constant 1 : index
      %c0_91 = arith.constant 0 : index
      %c0_92 = arith.constant 0 : index
      %226 = vector.load %arg7[%c1_90, %c0_91, %c0_92] : memref<8x8x128xf32, #tpu.memory_space<vmem>>, vector<1x8x128xf32>
      %227 = vector.shape_cast %226 : vector<1x8x128xf32> to vector<8x128xf32>
      %228 = vector.shape_cast %225 : vector<8x128xf32> to vector<1x8x128xf32>
      tpu.vector_store %arg7[%c1_90, %c0_91, %c0_92], %228 {strides = array<i32>} : memref<8x8x128xf32, #tpu.memory_space<vmem>>, vector<1x8x128xf32>,
      %c0_93 = arith.constant 0 : index
      %c5_94 = arith.constant 5 : index
      %c0_95 = arith.constant 0 : index
      %c0_96 = arith.constant 0 : index
      %229 = vector.load %arg2[%c0_93, %c5_94, %c0_95, %c0_96] : memref<1x8x8x128xf32, #tpu.memory_space<vmem>>, vector<1x1x8x128xf32>
      %230 = vector.shape_cast %229 : vector<1x1x8x128xf32> to vector<8x128xf32>
      %c2_97 = arith.constant 2 : index
      %c0_98 = arith.constant 0 : index
      %c0_99 = arith.constant 0 : index
      %231 = vector.load %arg7[%c2_97, %c0_98, %c0_99] : memref<8x8x128xf32, #tpu.memory_space<vmem>>, vector<1x8x128xf32>
      %232 = vector.shape_cast %231 : vector<1x8x128xf32> to vector<8x128xf32>
      %233 = vector.shape_cast %230 : vector<8x128xf32> to vector<1x8x128xf32>
      tpu.vector_store %arg7[%c2_97, %c0_98, %c0_99], %233 {strides = array<i32>} : memref<8x8x128xf32, #tpu.memory_space<vmem>>, vector<1x8x128xf32>,
      %c0_100 = arith.constant 0 : index
      %c4_101 = arith.constant 4 : index
      %c0_102 = arith.constant 0 : index
      %c0_103 = arith.constant 0 : index
      %234 = vector.load %arg2[%c0_100, %c4_101, %c0_102, %c0_103] : memref<1x8x8x128xf32, #tpu.memory_space<vmem>>, vector<1x1x8x128xf32>
      %235 = vector.shape_cast %234 : vector<1x1x8x128xf32> to vector<8x128xf32>
      %c3_104 = arith.constant 3 : index
      %c0_105 = arith.constant 0 : index
      %c0_106 = arith.constant 0 : index
      %236 = vector.load %arg7[%c3_104, %c0_105, %c0_106] : memref<8x8x128xf32, #tpu.memory_space<vmem>>, vector<1x8x128xf32>
      %237 = vector.shape_cast %236 : vector<1x8x128xf32> to vector<8x128xf32>
      %238 = vector.shape_cast %235 : vector<8x128xf32> to vector<1x8x128xf32>
      tpu.vector_store %arg7[%c3_104, %c0_105, %c0_106], %238 {strides = array<i32>} : memref<8x8x128xf32, #tpu.memory_space<vmem>>, vector<1x8x128xf32>,
      %c0_107 = arith.constant 0 : index
      %c3_108 = arith.constant 3 : index
      %c0_109 = arith.constant 0 : index
      %c0_110 = arith.constant 0 : index
      %239 = vector.load %arg2[%c0_107, %c3_108, %c0_109, %c0_110] : memref<1x8x8x128xf32, #tpu.memory_space<vmem>>, vector<1x1x8x128xf32>
      %240 = vector.shape_cast %239 : vector<1x1x8x128xf32> to vector<8x128xf32>
      %c4_111 = arith.constant 4 : index
      %c0_112 = arith.constant 0 : index
      %c0_113 = arith.constant 0 : index
      %241 = vector.load %arg7[%c4_111, %c0_112, %c0_113] : memref<8x8x128xf32, #tpu.memory_space<vmem>>, vector<1x8x128xf32>
      %242 = vector.shape_cast %241 : vector<1x8x128xf32> to vector<8x128xf32>
      %243 = vector.shape_cast %240 : vector<8x128xf32> to vector<1x8x128xf32>
      tpu.vector_store %arg7[%c4_111, %c0_112, %c0_113], %243 {strides = array<i32>} : memref<8x8x128xf32, #tpu.memory_space<vmem>>, vector<1x8x128xf32>,
      %c0_114 = arith.constant 0 : index
      %c2_115 = arith.constant 2 : index
      %c0_116 = arith.constant 0 : index
      %c0_117 = arith.constant 0 : index
      %244 = vector.load %arg2[%c0_114, %c2_115, %c0_116, %c0_117] : memref<1x8x8x128xf32, #tpu.memory_space<vmem>>, vector<1x1x8x128xf32>
      %245 = vector.shape_cast %244 : vector<1x1x8x128xf32> to vector<8x128xf32>
      %c5_118 = arith.constant 5 : index
      %c0_119 = arith.constant 0 : index
      %c0_120 = arith.constant 0 : index
      %246 = vector.load %arg7[%c5_118, %c0_119, %c0_120] : memref<8x8x128xf32, #tpu.memory_space<vmem>>, vector<1x8x128xf32>
      %247 = vector.shape_cast %246 : vector<1x8x128xf32> to vector<8x128xf32>
      %248 = vector.shape_cast %245 : vector<8x128xf32> to vector<1x8x128xf32>
      tpu.vector_store %arg7[%c5_118, %c0_119, %c0_120], %248 {strides = array<i32>} : memref<8x8x128xf32, #tpu.memory_space<vmem>>, vector<1x8x128xf32>,
      %c0_121 = arith.constant 0 : index
      %c1_122 = arith.constant 1 : index
      %c0_123 = arith.constant 0 : index
      %c0_124 = arith.constant 0 : index
      %249 = vector.load %arg2[%c0_121, %c1_122, %c0_123, %c0_124] : memref<1x8x8x128xf32, #tpu.memory_space<vmem>>, vector<1x1x8x128xf32>
      %250 = vector.shape_cast %249 : vector<1x1x8x128xf32> to vector<8x128xf32>
      %c6_125 = arith.constant 6 : index
      %c0_126 = arith.constant 0 : index
      %c0_127 = arith.constant 0 : index
      %251 = vector.load %arg7[%c6_125, %c0_126, %c0_127] : memref<8x8x128xf32, #tpu.memory_space<vmem>>, vector<1x8x128xf32>
      %252 = vector.shape_cast %251 : vector<1x8x128xf32> to vector<8x128xf32>
      %253 = vector.shape_cast %250 : vector<8x128xf32> to vector<1x8x128xf32>
      tpu.vector_store %arg7[%c6_125, %c0_126, %c0_127], %253 {strides = array<i32>} : memref<8x8x128xf32, #tpu.memory_space<vmem>>, vector<1x8x128xf32>,
      %c0_128 = arith.constant 0 : index
      %c0_129 = arith.constant 0 : index
      %c0_130 = arith.constant 0 : index
      %c0_131 = arith.constant 0 : index
      %254 = vector.load %arg2[%c0_128, %c0_129, %c0_130, %c0_131] : memref<1x8x8x128xf32, #tpu.memory_space<vmem>>, vector<1x1x8x128xf32>
      %255 = vector.shape_cast %254 : vector<1x1x8x128xf32> to vector<8x128xf32>
      %c7_132 = arith.constant 7 : index
      %c0_133 = arith.constant 0 : index
      %c0_134 = arith.constant 0 : index
      %256 = vector.load %arg7[%c7_132, %c0_133, %c0_134] : memref<8x8x128xf32, #tpu.memory_space<vmem>>, vector<1x8x128xf32>
      %257 = vector.shape_cast %256 : vector<1x8x128xf32> to vector<8x128xf32>
      %258 = vector.shape_cast %255 : vector<8x128xf32> to vector<1x8x128xf32>
      tpu.vector_store %arg7[%c7_132, %c0_133, %c0_134], %258 {strides = array<i32>} : memref<8x8x128xf32, #tpu.memory_space<vmem>>, vector<1x8x128xf32>,
    } else {
    }
    %c0 = arith.constant 0 : index
    %c0_5 = arith.constant 0 : index
    %c0_6 = arith.constant 0 : index
    %9 = vector.load %arg3[%c0, %c0_5, %c0_6] : memref<1x32x128xbf16, #tpu.memory_space<vmem>>, vector<1x32x128xbf16>
    %10 = vector.shape_cast %9 : vector<1x32x128xbf16> to vector<32x128xbf16>
    %c0_7 = arith.constant 0 : index
    %c0_8 = arith.constant 0 : index
    %c0_9 = arith.constant 0 : index
    %11 = vector.load %arg5[%c0_7, %c0_8, %c0_9] : memref<1x8x32xf32, #tpu.memory_space<vmem>>, vector<1x8x32xf32>
    %12 = vector.shape_cast %11 : vector<1x8x32xf32> to vector<8x32xf32>
    %c0_10 = arith.constant 0 : index
    %c0_11 = arith.constant 0 : index
    %c0_12 = arith.constant 0 : index
    %13 = vector.load %arg6[%c0_10, %c0_11, %c0_12] : memref<1x8x32xf32, #tpu.memory_space<vmem>>, vector<1x8x32xf32>
    %14 = vector.shape_cast %13 : vector<1x8x32xf32> to vector<8x32xf32>
    %c0_13 = arith.constant 0 : index
    %c0_14 = arith.constant 0 : index
    %c0_15 = arith.constant 0 : index
    %15 = vector.load %arg7[%c0_13, %c0_14, %c0_15] : memref<8x8x128xf32, #tpu.memory_space<vmem>>, vector<1x8x128xf32>
    %16 = vector.shape_cast %15 : vector<1x8x128xf32> to vector<8x128xf32>
    %17 = arith.truncf %12 : vector<8x32xf32> to vector<8x32xbf16>
    %cst = arith.constant dense<0.000000e+00> : vector<8x128xf32>
    %18 = tpu.matmul %17, %10, %cst {dimension_numbers = #tpu.dot_dimension_numbers<[1], [0], [0], [1], [0, 0, 1, 1], [], []>} : vector<8x32xbf16>, vector<32x128xbf16>, vector<8x128xf32> -> vector<8x128xf32>
    %19 = arith.addf %16, %18 : vector<8x128xf32>
    %20 = vector.extract_strided_slice %19 {offsets = [0, 0], sizes = [8, 96], strides = [1, 1]} : vector<8x128xf32> to vector<8x96xf32>
    %21 = arith.negf %20 : vector<8x96xf32>
    %22 = math.exp %21 : vector<8x96xf32>
    %cst_16 = arith.constant 1.000000e+00 : f32
    %23 = vector.broadcast %cst_16 : f32 to vector<8x96xf32>
    %24 = arith.addf %23, %22 : vector<8x96xf32>
    %25 = arith.divf %23, %24 : vector<8x96xf32>
    %26 = vector.extract_strided_slice %19 {offsets = [0, 96], sizes = [8, 32], strides = [1, 1]} : vector<8x128xf32> to vector<8x32xf32>
    %27 = math.tanh %26 : vector<8x32xf32>
    %28 = vector.extract_strided_slice %25 {offsets = [0, 0], sizes = [8, 32], strides = [1, 1]} : vector<8x96xf32> to vector<8x32xf32>
    %29 = vector.extract_strided_slice %25 {offsets = [0, 32], sizes = [8, 32], strides = [1, 1]} : vector<8x96xf32> to vector<8x32xf32>
    %30 = vector.extract_strided_slice %25 {offsets = [0, 64], sizes = [8, 32], strides = [1, 1]} : vector<8x96xf32> to vector<8x32xf32>
    %31 = arith.mulf %29, %14 : vector<8x32xf32>
    %32 = arith.mulf %28, %27 : vector<8x32xf32>
    %33 = arith.addf %31, %32 : vector<8x32xf32>
    %34 = math.tanh %33 : vector<8x32xf32>
    %35 = arith.mulf %30, %34 : vector<8x32xf32>
    %c0_17 = arith.constant 0 : index
    %c0_18 = arith.constant 0 : index
    %c0_19 = arith.constant 0 : index
    %36 = vector.load %arg8[%c0_17, %c0_18, %c0_19] : memref<8x8x32xf32, #tpu.memory_space<vmem>>, vector<1x8x32xf32>
    %37 = vector.shape_cast %36 : vector<1x8x32xf32> to vector<8x32xf32>
    %38 = vector.shape_cast %35 : vector<8x32xf32> to vector<1x8x32xf32>
    tpu.vector_store %arg8[%c0_17, %c0_18, %c0_19], %38 {strides = array<i32>} : memref<8x8x32xf32, #tpu.memory_space<vmem>>, vector<1x8x32xf32>,
    %c1 = arith.constant 1 : index
    %c0_20 = arith.constant 0 : index
    %c0_21 = arith.constant 0 : index
    %39 = vector.load %arg7[%c1, %c0_20, %c0_21] : memref<8x8x128xf32, #tpu.memory_space<vmem>>, vector<1x8x128xf32>
    %40 = vector.shape_cast %39 : vector<1x8x128xf32> to vector<8x128xf32>
    %41 = arith.truncf %35 : vector<8x32xf32> to vector<8x32xbf16>
    %cst_22 = arith.constant dense<0.000000e+00> : vector<8x128xf32>
    %42 = tpu.matmul %41, %10, %cst_22 {dimension_numbers = #tpu.dot_dimension_numbers<[1], [0], [0], [1], [0, 0, 1, 1], [], []>} : vector<8x32xbf16>, vector<32x128xbf16>, vector<8x128xf32> -> vector<8x128xf32>
    %43 = arith.addf %40, %42 : vector<8x128xf32>
    %44 = vector.extract_strided_slice %43 {offsets = [0, 0], sizes = [8, 96], strides = [1, 1]} : vector<8x128xf32> to vector<8x96xf32>
    %45 = arith.negf %44 : vector<8x96xf32>
    %46 = math.exp %45 : vector<8x96xf32>
    %cst_23 = arith.constant 1.000000e+00 : f32
    %47 = vector.broadcast %cst_23 : f32 to vector<8x96xf32>
    %48 = arith.addf %47, %46 : vector<8x96xf32>
    %49 = arith.divf %47, %48 : vector<8x96xf32>
    %50 = vector.extract_strided_slice %43 {offsets = [0, 96], sizes = [8, 32], strides = [1, 1]} : vector<8x128xf32> to vector<8x32xf32>
    %51 = math.tanh %50 : vector<8x32xf32>
    %52 = vector.extract_strided_slice %49 {offsets = [0, 0], sizes = [8, 32], strides = [1, 1]} : vector<8x96xf32> to vector<8x32xf32>
    %53 = vector.extract_strided_slice %49 {offsets = [0, 32], sizes = [8, 32], strides = [1, 1]} : vector<8x96xf32> to vector<8x32xf32>
    %54 = vector.extract_strided_slice %49 {offsets = [0, 64], sizes = [8, 32], strides = [1, 1]} : vector<8x96xf32> to vector<8x32xf32>
    %55 = arith.mulf %53, %33 : vector<8x32xf32>
    %56 = arith.mulf %52, %51 : vector<8x32xf32>
    %57 = arith.addf %55, %56 : vector<8x32xf32>
    %58 = math.tanh %57 : vector<8x32xf32>
    %59 = arith.mulf %54, %58 : vector<8x32xf32>
    %c1_24 = arith.constant 1 : index
    %c0_25 = arith.constant 0 : index
    %c0_26 = arith.constant 0 : index
    %60 = vector.load %arg8[%c1_24, %c0_25, %c0_26] : memref<8x8x32xf32, #tpu.memory_space<vmem>>, vector<1x8x32xf32>
    %61 = vector.shape_cast %60 : vector<1x8x32xf32> to vector<8x32xf32>
    %62 = vector.shape_cast %59 : vector<8x32xf32> to vector<1x8x32xf32>
    tpu.vector_store %arg8[%c1_24, %c0_25, %c0_26], %62 {strides = array<i32>} : memref<8x8x32xf32, #tpu.memory_space<vmem>>, vector<1x8x32xf32>,
    %c2 = arith.constant 2 : index
    %c0_27 = arith.constant 0 : index
    %c0_28 = arith.constant 0 : index
    %63 = vector.load %arg7[%c2, %c0_27, %c0_28] : memref<8x8x128xf32, #tpu.memory_space<vmem>>, vector<1x8x128xf32>
    %64 = vector.shape_cast %63 : vector<1x8x128xf32> to vector<8x128xf32>
    %65 = arith.truncf %59 : vector<8x32xf32> to vector<8x32xbf16>
    %cst_29 = arith.constant dense<0.000000e+00> : vector<8x128xf32>
    %66 = tpu.matmul %65, %10, %cst_29 {dimension_numbers = #tpu.dot_dimension_numbers<[1], [0], [0], [1], [0, 0, 1, 1], [], []>} : vector<8x32xbf16>, vector<32x128xbf16>, vector<8x128xf32> -> vector<8x128xf32>
    %67 = arith.addf %64, %66 : vector<8x128xf32>
    %68 = vector.extract_strided_slice %67 {offsets = [0, 0], sizes = [8, 96], strides = [1, 1]} : vector<8x128xf32> to vector<8x96xf32>
    %69 = arith.negf %68 : vector<8x96xf32>
    %70 = math.exp %69 : vector<8x96xf32>
    %cst_30 = arith.constant 1.000000e+00 : f32
    %71 = vector.broadcast %cst_30 : f32 to vector<8x96xf32>
    %72 = arith.addf %71, %70 : vector<8x96xf32>
    %73 = arith.divf %71, %72 : vector<8x96xf32>
    %74 = vector.extract_strided_slice %67 {offsets = [0, 96], sizes = [8, 32], strides = [1, 1]} : vector<8x128xf32> to vector<8x32xf32>
    %75 = math.tanh %74 : vector<8x32xf32>
    %76 = vector.extract_strided_slice %73 {offsets = [0, 0], sizes = [8, 32], strides = [1, 1]} : vector<8x96xf32> to vector<8x32xf32>
    %77 = vector.extract_strided_slice %73 {offsets = [0, 32], sizes = [8, 32], strides = [1, 1]} : vector<8x96xf32> to vector<8x32xf32>
    %78 = vector.extract_strided_slice %73 {offsets = [0, 64], sizes = [8, 32], strides = [1, 1]} : vector<8x96xf32> to vector<8x32xf32>
    %79 = arith.mulf %77, %57 : vector<8x32xf32>
    %80 = arith.mulf %76, %75 : vector<8x32xf32>
    %81 = arith.addf %79, %80 : vector<8x32xf32>
    %82 = math.tanh %81 : vector<8x32xf32>
    %83 = arith.mulf %78, %82 : vector<8x32xf32>
    %c2_31 = arith.constant 2 : index
    %c0_32 = arith.constant 0 : index
    %c0_33 = arith.constant 0 : index
    %84 = vector.load %arg8[%c2_31, %c0_32, %c0_33] : memref<8x8x32xf32, #tpu.memory_space<vmem>>, vector<1x8x32xf32>
    %85 = vector.shape_cast %84 : vector<1x8x32xf32> to vector<8x32xf32>
    %86 = vector.shape_cast %83 : vector<8x32xf32> to vector<1x8x32xf32>
    tpu.vector_store %arg8[%c2_31, %c0_32, %c0_33], %86 {strides = array<i32>} : memref<8x8x32xf32, #tpu.memory_space<vmem>>, vector<1x8x32xf32>,
    %c3 = arith.constant 3 : index
    %c0_34 = arith.constant 0 : index
    %c0_35 = arith.constant 0 : index
    %87 = vector.load %arg7[%c3, %c0_34, %c0_35] : memref<8x8x128xf32, #tpu.memory_space<vmem>>, vector<1x8x128xf32>
    %88 = vector.shape_cast %87 : vector<1x8x128xf32> to vector<8x128xf32>
    %89 = arith.truncf %83 : vector<8x32xf32> to vector<8x32xbf16>
    %cst_36 = arith.constant dense<0.000000e+00> : vector<8x128xf32>
    %90 = tpu.matmul %89, %10, %cst_36 {dimension_numbers = #tpu.dot_dimension_numbers<[1], [0], [0], [1], [0, 0, 1, 1], [], []>} : vector<8x32xbf16>, vector<32x128xbf16>, vector<8x128xf32> -> vector<8x128xf32>
    %91 = arith.addf %88, %90 : vector<8x128xf32>
    %92 = vector.extract_strided_slice %91 {offsets = [0, 0], sizes = [8, 96], strides = [1, 1]} : vector<8x128xf32> to vector<8x96xf32>
    %93 = arith.negf %92 : vector<8x96xf32>
    %94 = math.exp %93 : vector<8x96xf32>
    %cst_37 = arith.constant 1.000000e+00 : f32
    %95 = vector.broadcast %cst_37 : f32 to vector<8x96xf32>
    %96 = arith.addf %95, %94 : vector<8x96xf32>
    %97 = arith.divf %95, %96 : vector<8x96xf32>
    %98 = vector.extract_strided_slice %91 {offsets = [0, 96], sizes = [8, 32], strides = [1, 1]} : vector<8x128xf32> to vector<8x32xf32>
    %99 = math.tanh %98 : vector<8x32xf32>
    %100 = vector.extract_strided_slice %97 {offsets = [0, 0], sizes = [8, 32], strides = [1, 1]} : vector<8x96xf32> to vector<8x32xf32>
    %101 = vector.extract_strided_slice %97 {offsets = [0, 32], sizes = [8, 32], strides = [1, 1]} : vector<8x96xf32> to vector<8x32xf32>
    %102 = vector.extract_strided_slice %97 {offsets = [0, 64], sizes = [8, 32], strides = [1, 1]} : vector<8x96xf32> to vector<8x32xf32>
    %103 = arith.mulf %101, %81 : vector<8x32xf32>
    %104 = arith.mulf %100, %99 : vector<8x32xf32>
    %105 = arith.addf %103, %104 : vector<8x32xf32>
    %106 = math.tanh %105 : vector<8x32xf32>
    %107 = arith.mulf %102, %106 : vector<8x32xf32>
    %c3_38 = arith.constant 3 : index
    %c0_39 = arith.constant 0 : index
    %c0_40 = arith.constant 0 : index
    %108 = vector.load %arg8[%c3_38, %c0_39, %c0_40] : memref<8x8x32xf32, #tpu.memory_space<vmem>>, vector<1x8x32xf32>
    %109 = vector.shape_cast %108 : vector<1x8x32xf32> to vector<8x32xf32>
    %110 = vector.shape_cast %107 : vector<8x32xf32> to vector<1x8x32xf32>
    tpu.vector_store %arg8[%c3_38, %c0_39, %c0_40], %110 {strides = array<i32>} : memref<8x8x32xf32, #tpu.memory_space<vmem>>, vector<1x8x32xf32>,
    %c4 = arith.constant 4 : index
    %c0_41 = arith.constant 0 : index
    %c0_42 = arith.constant 0 : index
    %111 = vector.load %arg7[%c4, %c0_41, %c0_42] : memref<8x8x128xf32, #tpu.memory_space<vmem>>, vector<1x8x128xf32>
    %112 = vector.shape_cast %111 : vector<1x8x128xf32> to vector<8x128xf32>
    %113 = arith.truncf %107 : vector<8x32xf32> to vector<8x32xbf16>
    %cst_43 = arith.constant dense<0.000000e+00> : vector<8x128xf32>
    %114 = tpu.matmul %113, %10, %cst_43 {dimension_numbers = #tpu.dot_dimension_numbers<[1], [0], [0], [1], [0, 0, 1, 1], [], []>} : vector<8x32xbf16>, vector<32x128xbf16>, vector<8x128xf32> -> vector<8x128xf32>
    %115 = arith.addf %112, %114 : vector<8x128xf32>
    %116 = vector.extract_strided_slice %115 {offsets = [0, 0], sizes = [8, 96], strides = [1, 1]} : vector<8x128xf32> to vector<8x96xf32>
    %117 = arith.negf %116 : vector<8x96xf32>
    %118 = math.exp %117 : vector<8x96xf32>
    %cst_44 = arith.constant 1.000000e+00 : f32
    %119 = vector.broadcast %cst_44 : f32 to vector<8x96xf32>
    %120 = arith.addf %119, %118 : vector<8x96xf32>
    %121 = arith.divf %119, %120 : vector<8x96xf32>
    %122 = vector.extract_strided_slice %115 {offsets = [0, 96], sizes = [8, 32], strides = [1, 1]} : vector<8x128xf32> to vector<8x32xf32>
    %123 = math.tanh %122 : vector<8x32xf32>
    %124 = vector.extract_strided_slice %121 {offsets = [0, 0], sizes = [8, 32], strides = [1, 1]} : vector<8x96xf32> to vector<8x32xf32>
    %125 = vector.extract_strided_slice %121 {offsets = [0, 32], sizes = [8, 32], strides = [1, 1]} : vector<8x96xf32> to vector<8x32xf32>
    %126 = vector.extract_strided_slice %121 {offsets = [0, 64], sizes = [8, 32], strides = [1, 1]} : vector<8x96xf32> to vector<8x32xf32>
    %127 = arith.mulf %125, %105 : vector<8x32xf32>
    %128 = arith.mulf %124, %123 : vector<8x32xf32>
    %129 = arith.addf %127, %128 : vector<8x32xf32>
    %130 = math.tanh %129 : vector<8x32xf32>
    %131 = arith.mulf %126, %130 : vector<8x32xf32>
    %c4_45 = arith.constant 4 : index
    %c0_46 = arith.constant 0 : index
    %c0_47 = arith.constant 0 : index
    %132 = vector.load %arg8[%c4_45, %c0_46, %c0_47] : memref<8x8x32xf32, #tpu.memory_space<vmem>>, vector<1x8x32xf32>
    %133 = vector.shape_cast %132 : vector<1x8x32xf32> to vector<8x32xf32>
    %134 = vector.shape_cast %131 : vector<8x32xf32> to vector<1x8x32xf32>
    tpu.vector_store %arg8[%c4_45, %c0_46, %c0_47], %134 {strides = array<i32>} : memref<8x8x32xf32, #tpu.memory_space<vmem>>, vector<1x8x32xf32>,
    %c5 = arith.constant 5 : index
    %c0_48 = arith.constant 0 : index
    %c0_49 = arith.constant 0 : index
    %135 = vector.load %arg7[%c5, %c0_48, %c0_49] : memref<8x8x128xf32, #tpu.memory_space<vmem>>, vector<1x8x128xf32>
    %136 = vector.shape_cast %135 : vector<1x8x128xf32> to vector<8x128xf32>
    %137 = arith.truncf %131 : vector<8x32xf32> to vector<8x32xbf16>
    %cst_50 = arith.constant dense<0.000000e+00> : vector<8x128xf32>
    %138 = tpu.matmul %137, %10, %cst_50 {dimension_numbers = #tpu.dot_dimension_numbers<[1], [0], [0], [1], [0, 0, 1, 1], [], []>} : vector<8x32xbf16>, vector<32x128xbf16>, vector<8x128xf32> -> vector<8x128xf32>
    %139 = arith.addf %136, %138 : vector<8x128xf32>
    %140 = vector.extract_strided_slice %139 {offsets = [0, 0], sizes = [8, 96], strides = [1, 1]} : vector<8x128xf32> to vector<8x96xf32>
    %141 = arith.negf %140 : vector<8x96xf32>
    %142 = math.exp %141 : vector<8x96xf32>
    %cst_51 = arith.constant 1.000000e+00 : f32
    %143 = vector.broadcast %cst_51 : f32 to vector<8x96xf32>
    %144 = arith.addf %143, %142 : vector<8x96xf32>
    %145 = arith.divf %143, %144 : vector<8x96xf32>
    %146 = vector.extract_strided_slice %139 {offsets = [0, 96], sizes = [8, 32], strides = [1, 1]} : vector<8x128xf32> to vector<8x32xf32>
    %147 = math.tanh %146 : vector<8x32xf32>
    %148 = vector.extract_strided_slice %145 {offsets = [0, 0], sizes = [8, 32], strides = [1, 1]} : vector<8x96xf32> to vector<8x32xf32>
    %149 = vector.extract_strided_slice %145 {offsets = [0, 32], sizes = [8, 32], strides = [1, 1]} : vector<8x96xf32> to vector<8x32xf32>
    %150 = vector.extract_strided_slice %145 {offsets = [0, 64], sizes = [8, 32], strides = [1, 1]} : vector<8x96xf32> to vector<8x32xf32>
    %151 = arith.mulf %149, %129 : vector<8x32xf32>
    %152 = arith.mulf %148, %147 : vector<8x32xf32>
    %153 = arith.addf %151, %152 : vector<8x32xf32>
    %154 = math.tanh %153 : vector<8x32xf32>
    %155 = arith.mulf %150, %154 : vector<8x32xf32>
    %c5_52 = arith.constant 5 : index
    %c0_53 = arith.constant 0 : index
    %c0_54 = arith.constant 0 : index
    %156 = vector.load %arg8[%c5_52, %c0_53, %c0_54] : memref<8x8x32xf32, #tpu.memory_space<vmem>>, vector<1x8x32xf32>
    %157 = vector.shape_cast %156 : vector<1x8x32xf32> to vector<8x32xf32>
    %158 = vector.shape_cast %155 : vector<8x32xf32> to vector<1x8x32xf32>
    tpu.vector_store %arg8[%c5_52, %c0_53, %c0_54], %158 {strides = array<i32>} : memref<8x8x32xf32, #tpu.memory_space<vmem>>, vector<1x8x32xf32>,
    %c6 = arith.constant 6 : index
    %c0_55 = arith.constant 0 : index
    %c0_56 = arith.constant 0 : index
    %159 = vector.load %arg7[%c6, %c0_55, %c0_56] : memref<8x8x128xf32, #tpu.memory_space<vmem>>, vector<1x8x128xf32>
    %160 = vector.shape_cast %159 : vector<1x8x128xf32> to vector<8x128xf32>
    %161 = arith.truncf %155 : vector<8x32xf32> to vector<8x32xbf16>
    %cst_57 = arith.constant dense<0.000000e+00> : vector<8x128xf32>
    %162 = tpu.matmul %161, %10, %cst_57 {dimension_numbers = #tpu.dot_dimension_numbers<[1], [0], [0], [1], [0, 0, 1, 1], [], []>} : vector<8x32xbf16>, vector<32x128xbf16>, vector<8x128xf32> -> vector<8x128xf32>
    %163 = arith.addf %160, %162 : vector<8x128xf32>
    %164 = vector.extract_strided_slice %163 {offsets = [0, 0], sizes = [8, 96], strides = [1, 1]} : vector<8x128xf32> to vector<8x96xf32>
    %165 = arith.negf %164 : vector<8x96xf32>
    %166 = math.exp %165 : vector<8x96xf32>
    %cst_58 = arith.constant 1.000000e+00 : f32
    %167 = vector.broadcast %cst_58 : f32 to vector<8x96xf32>
    %168 = arith.addf %167, %166 : vector<8x96xf32>
    %169 = arith.divf %167, %168 : vector<8x96xf32>
    %170 = vector.extract_strided_slice %163 {offsets = [0, 96], sizes = [8, 32], strides = [1, 1]} : vector<8x128xf32> to vector<8x32xf32>
    %171 = math.tanh %170 : vector<8x32xf32>
    %172 = vector.extract_strided_slice %169 {offsets = [0, 0], sizes = [8, 32], strides = [1, 1]} : vector<8x96xf32> to vector<8x32xf32>
    %173 = vector.extract_strided_slice %169 {offsets = [0, 32], sizes = [8, 32], strides = [1, 1]} : vector<8x96xf32> to vector<8x32xf32>
    %174 = vector.extract_strided_slice %169 {offsets = [0, 64], sizes = [8, 32], strides = [1, 1]} : vector<8x96xf32> to vector<8x32xf32>
    %175 = arith.mulf %173, %153 : vector<8x32xf32>
    %176 = arith.mulf %172, %171 : vector<8x32xf32>
    %177 = arith.addf %175, %176 : vector<8x32xf32>
    %178 = math.tanh %177 : vector<8x32xf32>
    %179 = arith.mulf %174, %178 : vector<8x32xf32>
    %c6_59 = arith.constant 6 : index
    %c0_60 = arith.constant 0 : index
    %c0_61 = arith.constant 0 : index
    %180 = vector.load %arg8[%c6_59, %c0_60, %c0_61] : memref<8x8x32xf32, #tpu.memory_space<vmem>>, vector<1x8x32xf32>
    %181 = vector.shape_cast %180 : vector<1x8x32xf32> to vector<8x32xf32>
    %182 = vector.shape_cast %179 : vector<8x32xf32> to vector<1x8x32xf32>
    tpu.vector_store %arg8[%c6_59, %c0_60, %c0_61], %182 {strides = array<i32>} : memref<8x8x32xf32, #tpu.memory_space<vmem>>, vector<1x8x32xf32>,
    %c7 = arith.constant 7 : index
    %c0_62 = arith.constant 0 : index
    %c0_63 = arith.constant 0 : index
    %183 = vector.load %arg7[%c7, %c0_62, %c0_63] : memref<8x8x128xf32, #tpu.memory_space<vmem>>, vector<1x8x128xf32>
    %184 = vector.shape_cast %183 : vector<1x8x128xf32> to vector<8x128xf32>
    %185 = arith.truncf %179 : vector<8x32xf32> to vector<8x32xbf16>
    %cst_64 = arith.constant dense<0.000000e+00> : vector<8x128xf32>
    %186 = tpu.matmul %185, %10, %cst_64 {dimension_numbers = #tpu.dot_dimension_numbers<[1], [0], [0], [1], [0, 0, 1, 1], [], []>} : vector<8x32xbf16>, vector<32x128xbf16>, vector<8x128xf32> -> vector<8x128xf32>
    %187 = arith.addf %184, %186 : vector<8x128xf32>
    %188 = vector.extract_strided_slice %187 {offsets = [0, 0], sizes = [8, 96], strides = [1, 1]} : vector<8x128xf32> to vector<8x96xf32>
    %189 = arith.negf %188 : vector<8x96xf32>
    %190 = math.exp %189 : vector<8x96xf32>
    %cst_65 = arith.constant 1.000000e+00 : f32
    %191 = vector.broadcast %cst_65 : f32 to vector<8x96xf32>
    %192 = arith.addf %191, %190 : vector<8x96xf32>
    %193 = arith.divf %191, %192 : vector<8x96xf32>
    %194 = vector.extract_strided_slice %187 {offsets = [0, 96], sizes = [8, 32], strides = [1, 1]} : vector<8x128xf32> to vector<8x32xf32>
    %195 = math.tanh %194 : vector<8x32xf32>
    %196 = vector.extract_strided_slice %193 {offsets = [0, 0], sizes = [8, 32], strides = [1, 1]} : vector<8x96xf32> to vector<8x32xf32>
    %197 = vector.extract_strided_slice %193 {offsets = [0, 32], sizes = [8, 32], strides = [1, 1]} : vector<8x96xf32> to vector<8x32xf32>
    %198 = vector.extract_strided_slice %193 {offsets = [0, 64], sizes = [8, 32], strides = [1, 1]} : vector<8x96xf32> to vector<8x32xf32>
    %199 = arith.mulf %197, %177 : vector<8x32xf32>
    %200 = arith.mulf %196, %195 : vector<8x32xf32>
    %201 = arith.addf %199, %200 : vector<8x32xf32>
    %202 = math.tanh %201 : vector<8x32xf32>
    %203 = arith.mulf %198, %202 : vector<8x32xf32>
    %c7_66 = arith.constant 7 : index
    %c0_67 = arith.constant 0 : index
    %c0_68 = arith.constant 0 : index
    %204 = vector.load %arg8[%c7_66, %c0_67, %c0_68] : memref<8x8x32xf32, #tpu.memory_space<vmem>>, vector<1x8x32xf32>
    %205 = vector.shape_cast %204 : vector<1x8x32xf32> to vector<8x32xf32>
    %206 = vector.shape_cast %203 : vector<8x32xf32> to vector<1x8x32xf32>
    tpu.vector_store %arg8[%c7_66, %c0_67, %c0_68], %206 {strides = array<i32>} : memref<8x8x32xf32, #tpu.memory_space<vmem>>, vector<1x8x32xf32>,
    %c0_69 = arith.constant 0 : index
    %c0_70 = arith.constant 0 : index
    %c0_71 = arith.constant 0 : index
    %207 = vector.load %arg5[%c0_69, %c0_70, %c0_71] : memref<1x8x32xf32, #tpu.memory_space<vmem>>, vector<1x8x32xf32>
    %208 = vector.shape_cast %207 : vector<1x8x32xf32> to vector<8x32xf32>
    %209 = vector.shape_cast %203 : vector<8x32xf32> to vector<1x8x32xf32>
    tpu.vector_store %arg5[%c0_69, %c0_70, %c0_71], %209 {strides = array<i32>} : memref<1x8x32xf32, #tpu.memory_space<vmem>>, vector<1x8x32xf32>,
    %c0_72 = arith.constant 0 : index
    %c0_73 = arith.constant 0 : index
    %c0_74 = arith.constant 0 : index
    %210 = vector.load %arg6[%c0_72, %c0_73, %c0_74] : memref<1x8x32xf32, #tpu.memory_space<vmem>>, vector<1x8x32xf32>
    %211 = vector.shape_cast %210 : vector<1x8x32xf32> to vector<8x32xf32>
    %212 = vector.shape_cast %201 : vector<8x32xf32> to vector<1x8x32xf32>
    tpu.vector_store %arg6[%c0_72, %c0_73, %c0_74], %212 {strides = array<i32>} : memref<1x8x32xf32, #tpu.memory_space<vmem>>, vector<1x8x32xf32>,
    %c0_i32_75 = arith.constant 0 : i32
    %213 = arith.cmpi eq, %arg0, %c0_i32_75 : i32
    %214 = arith.extui %213 : i1 to i32
    %c0_i32_76 = arith.constant 0 : i32
    %215 = arith.cmpi ne, %214, %c0_i32_76 : i32
    scf.if %215 {
      %c0_79 = arith.constant 0 : index
      %c0_80 = arith.constant 0 : index
      %c0_81 = arith.constant 0 : index
      %219 = vector.load %arg8[%c0_79, %c0_80, %c0_81] : memref<8x8x32xf32, #tpu.memory_space<vmem>>, vector<8x8x32xf32>
      %c0_82 = arith.constant 0 : index
      %c0_83 = arith.constant 0 : index
      %c0_84 = arith.constant 0 : index
      %c0_85 = arith.constant 0 : index
      %220 = vector.load %arg4[%c0_82, %c0_83, %c0_84, %c0_85] : memref<1x8x8x32xf32, #tpu.memory_space<vmem>>, vector<1x8x8x32xf32>
      %221 = vector.shape_cast %220 : vector<1x8x8x32xf32> to vector<8x8x32xf32>
      %222 = vector.shape_cast %219 : vector<8x8x32xf32> to vector<1x8x8x32xf32>
      tpu.vector_store %arg4[%c0_82, %c0_83, %c0_84, %c0_85], %222 {strides = array<i32>} : memref<1x8x8x32xf32, #tpu.memory_space<vmem>>, vector<1x8x8x32xf32>,
    } else {
    }
    %c0_i32_77 = arith.constant 0 : i32
    %216 = arith.cmpi ne, %arg0, %c0_i32_77 : i32
    %217 = arith.extui %216 : i1 to i32
    %c0_i32_78 = arith.constant 0 : i32
    %218 = arith.cmpi ne, %217, %c0_i32_78 : i32
    scf.if %218 {
      %c0_79 = arith.constant 0 : index
      %c0_80 = arith.constant 0 : index
      %c0_81 = arith.constant 0 : index
      %219 = vector.load %arg8[%c0_79, %c0_80, %c0_81] : memref<8x8x32xf32, #tpu.memory_space<vmem>>, vector<1x8x32xf32>
      %220 = vector.shape_cast %219 : vector<1x8x32xf32> to vector<8x32xf32>
      %c0_82 = arith.constant 0 : index
      %c7_83 = arith.constant 7 : index
      %c0_84 = arith.constant 0 : index
      %c0_85 = arith.constant 0 : index
      %221 = vector.load %arg4[%c0_82, %c7_83, %c0_84, %c0_85] : memref<1x8x8x32xf32, #tpu.memory_space<vmem>>, vector<1x1x8x32xf32>
      %222 = vector.shape_cast %221 : vector<1x1x8x32xf32> to vector<8x32xf32>
      %223 = vector.shape_cast %220 : vector<8x32xf32> to vector<1x1x8x32xf32>
      tpu.vector_store %arg4[%c0_82, %c7_83, %c0_84, %c0_85], %223 {strides = array<i32>} : memref<1x8x8x32xf32, #tpu.memory_space<vmem>>, vector<1x1x8x32xf32>,
      %c1_86 = arith.constant 1 : index
      %c0_87 = arith.constant 0 : index
      %c0_88 = arith.constant 0 : index
      %224 = vector.load %arg8[%c1_86, %c0_87, %c0_88] : memref<8x8x32xf32, #tpu.memory_space<vmem>>, vector<1x8x32xf32>
      %225 = vector.shape_cast %224 : vector<1x8x32xf32> to vector<8x32xf32>
      %c0_89 = arith.constant 0 : index
      %c6_90 = arith.constant 6 : index
      %c0_91 = arith.constant 0 : index
      %c0_92 = arith.constant 0 : index
      %226 = vector.load %arg4[%c0_89, %c6_90, %c0_91, %c0_92] : memref<1x8x8x32xf32, #tpu.memory_space<vmem>>, vector<1x1x8x32xf32>
      %227 = vector.shape_cast %226 : vector<1x1x8x32xf32> to vector<8x32xf32>
      %228 = vector.shape_cast %225 : vector<8x32xf32> to vector<1x1x8x32xf32>
      tpu.vector_store %arg4[%c0_89, %c6_90, %c0_91, %c0_92], %228 {strides = array<i32>} : memref<1x8x8x32xf32, #tpu.memory_space<vmem>>, vector<1x1x8x32xf32>,
      %c2_93 = arith.constant 2 : index
      %c0_94 = arith.constant 0 : index
      %c0_95 = arith.constant 0 : index
      %229 = vector.load %arg8[%c2_93, %c0_94, %c0_95] : memref<8x8x32xf32, #tpu.memory_space<vmem>>, vector<1x8x32xf32>
      %230 = vector.shape_cast %229 : vector<1x8x32xf32> to vector<8x32xf32>
      %c0_96 = arith.constant 0 : index
      %c5_97 = arith.constant 5 : index
      %c0_98 = arith.constant 0 : index
      %c0_99 = arith.constant 0 : index
      %231 = vector.load %arg4[%c0_96, %c5_97, %c0_98, %c0_99] : memref<1x8x8x32xf32, #tpu.memory_space<vmem>>, vector<1x1x8x32xf32>
      %232 = vector.shape_cast %231 : vector<1x1x8x32xf32> to vector<8x32xf32>
      %233 = vector.shape_cast %230 : vector<8x32xf32> to vector<1x1x8x32xf32>
      tpu.vector_store %arg4[%c0_96, %c5_97, %c0_98, %c0_99], %233 {strides = array<i32>} : memref<1x8x8x32xf32, #tpu.memory_space<vmem>>, vector<1x1x8x32xf32>,
      %c3_100 = arith.constant 3 : index
      %c0_101 = arith.constant 0 : index
      %c0_102 = arith.constant 0 : index
      %234 = vector.load %arg8[%c3_100, %c0_101, %c0_102] : memref<8x8x32xf32, #tpu.memory_space<vmem>>, vector<1x8x32xf32>
      %235 = vector.shape_cast %234 : vector<1x8x32xf32> to vector<8x32xf32>
      %c0_103 = arith.constant 0 : index
      %c4_104 = arith.constant 4 : index
      %c0_105 = arith.constant 0 : index
      %c0_106 = arith.constant 0 : index
      %236 = vector.load %arg4[%c0_103, %c4_104, %c0_105, %c0_106] : memref<1x8x8x32xf32, #tpu.memory_space<vmem>>, vector<1x1x8x32xf32>
      %237 = vector.shape_cast %236 : vector<1x1x8x32xf32> to vector<8x32xf32>
      %238 = vector.shape_cast %235 : vector<8x32xf32> to vector<1x1x8x32xf32>
      tpu.vector_store %arg4[%c0_103, %c4_104, %c0_105, %c0_106], %238 {strides = array<i32>} : memref<1x8x8x32xf32, #tpu.memory_space<vmem>>, vector<1x1x8x32xf32>,
      %c4_107 = arith.constant 4 : index
      %c0_108 = arith.constant 0 : index
      %c0_109 = arith.constant 0 : index
      %239 = vector.load %arg8[%c4_107, %c0_108, %c0_109] : memref<8x8x32xf32, #tpu.memory_space<vmem>>, vector<1x8x32xf32>
      %240 = vector.shape_cast %239 : vector<1x8x32xf32> to vector<8x32xf32>
      %c0_110 = arith.constant 0 : index
      %c3_111 = arith.constant 3 : index
      %c0_112 = arith.constant 0 : index
      %c0_113 = arith.constant 0 : index
      %241 = vector.load %arg4[%c0_110, %c3_111, %c0_112, %c0_113] : memref<1x8x8x32xf32, #tpu.memory_space<vmem>>, vector<1x1x8x32xf32>
      %242 = vector.shape_cast %241 : vector<1x1x8x32xf32> to vector<8x32xf32>
      %243 = vector.shape_cast %240 : vector<8x32xf32> to vector<1x1x8x32xf32>
      tpu.vector_store %arg4[%c0_110, %c3_111, %c0_112, %c0_113], %243 {strides = array<i32>} : memref<1x8x8x32xf32, #tpu.memory_space<vmem>>, vector<1x1x8x32xf32>,
      %c5_114 = arith.constant 5 : index
      %c0_115 = arith.constant 0 : index
      %c0_116 = arith.constant 0 : index
      %244 = vector.load %arg8[%c5_114, %c0_115, %c0_116] : memref<8x8x32xf32, #tpu.memory_space<vmem>>, vector<1x8x32xf32>
      %245 = vector.shape_cast %244 : vector<1x8x32xf32> to vector<8x32xf32>
      %c0_117 = arith.constant 0 : index
      %c2_118 = arith.constant 2 : index
      %c0_119 = arith.constant 0 : index
      %c0_120 = arith.constant 0 : index
      %246 = vector.load %arg4[%c0_117, %c2_118, %c0_119, %c0_120] : memref<1x8x8x32xf32, #tpu.memory_space<vmem>>, vector<1x1x8x32xf32>
      %247 = vector.shape_cast %246 : vector<1x1x8x32xf32> to vector<8x32xf32>
      %248 = vector.shape_cast %245 : vector<8x32xf32> to vector<1x1x8x32xf32>
      tpu.vector_store %arg4[%c0_117, %c2_118, %c0_119, %c0_120], %248 {strides = array<i32>} : memref<1x8x8x32xf32, #tpu.memory_space<vmem>>, vector<1x1x8x32xf32>,
      %c6_121 = arith.constant 6 : index
      %c0_122 = arith.constant 0 : index
      %c0_123 = arith.constant 0 : index
      %249 = vector.load %arg8[%c6_121, %c0_122, %c0_123] : memref<8x8x32xf32, #tpu.memory_space<vmem>>, vector<1x8x32xf32>
      %250 = vector.shape_cast %249 : vector<1x8x32xf32> to vector<8x32xf32>
      %c0_124 = arith.constant 0 : index
      %c1_125 = arith.constant 1 : index
      %c0_126 = arith.constant 0 : index
      %c0_127 = arith.constant 0 : index
      %251 = vector.load %arg4[%c0_124, %c1_125, %c0_126, %c0_127] : memref<1x8x8x32xf32, #tpu.memory_space<vmem>>, vector<1x1x8x32xf32>
      %252 = vector.shape_cast %251 : vector<1x1x8x32xf32> to vector<8x32xf32>
      %253 = vector.shape_cast %250 : vector<8x32xf32> to vector<1x1x8x32xf32>
      tpu.vector_store %arg4[%c0_124, %c1_125, %c0_126, %c0_127], %253 {strides = array<i32>} : memref<1x8x8x32xf32, #tpu.memory_space<vmem>>, vector<1x1x8x32xf32>,
      %c7_128 = arith.constant 7 : index
      %c0_129 = arith.constant 0 : index
      %c0_130 = arith.constant 0 : index
      %254 = vector.load %arg8[%c7_128, %c0_129, %c0_130] : memref<8x8x32xf32, #tpu.memory_space<vmem>>, vector<1x8x32xf32>
      %255 = vector.shape_cast %254 : vector<1x8x32xf32> to vector<8x32xf32>
      %c0_131 = arith.constant 0 : index
      %c0_132 = arith.constant 0 : index
      %c0_133 = arith.constant 0 : index
      %c0_134 = arith.constant 0 : index
      %256 = vector.load %arg4[%c0_131, %c0_132, %c0_133, %c0_134] : memref<1x8x8x32xf32, #tpu.memory_space<vmem>>, vector<1x1x8x32xf32>
      %257 = vector.shape_cast %256 : vector<1x1x8x32xf32> to vector<8x32xf32>
      %258 = vector.shape_cast %255 : vector<8x32xf32> to vector<1x1x8x32xf32>
      tpu.vector_store %arg4[%c0_131, %c0_132, %c0_133, %c0_134], %258 {strides = array<i32>} : memref<1x8x8x32xf32, #tpu.memory_space<vmem>>, vector<1x1x8x32xf32>,
    } else {
    }
    return
  }
  func.func @transform_0(%arg0: i32, %arg1: i32) -> (i32, i32, i32, i32) {
    %c2_i32 = arith.constant 2 : i32
    %0 = arith.muli %c2_i32, %arg1 : i32
    %c0_i32 = arith.constant 0 : i32
    %1 = arith.subi %c0_i32, %0 : i32
    %2 = arith.muli %arg0, %1 : i32
    %3 = arith.addi %arg1, %2 : i32
    %c0_i32_0 = arith.constant 0 : i32
    %c0_i32_1 = arith.constant 0 : i32
    %c0_i32_2 = arith.constant 0 : i32
    return %arg0, %3, %c0_i32_0, %c0_i32_1 : i32, i32, i32, i32
  }
  func.func @transform_1(%arg0: i32, %arg1: i32) -> (i32, i32, i32) {
    %c0_i32 = arith.constant 0 : i32
    %c0_i32_0 = arith.constant 0 : i32
    %c0_i32_1 = arith.constant 0 : i32
    return %arg0, %c0_i32, %c0_i32_0 : i32, i32, i32
  }
  func.func @transform_2(%arg0: i32, %arg1: i32) -> (i32, i32, i32, i32) {
    %c2_i32 = arith.constant 2 : i32
    %0 = arith.muli %c2_i32, %arg1 : i32
    %c0_i32 = arith.constant 0 : i32
    %1 = arith.subi %c0_i32, %0 : i32
    %2 = arith.muli %arg0, %1 : i32
    %3 = arith.addi %arg1, %2 : i32
    %c0_i32_0 = arith.constant 0 : i32
    %c0_i32_1 = arith.constant 0 : i32
    %c0_i32_2 = arith.constant 0 : i32
    return %arg0, %3, %c0_i32_0, %c0_i32_1 : i32, i32, i32, i32
  }
  func.func @transform_3(%arg0: i32, %arg1: i32) -> (i32, i32, i32) {
    %c0_i32 = arith.constant 0 : i32
    %c0_i32_0 = arith.constant 0 : i32
    %c0_i32_1 = arith.constant 0 : i32
    return %arg0, %c0_i32, %c0_i32_0 : i32, i32, i32
  }
  func.func @transform_4(%arg0: i32, %arg1: i32) -> (i32, i32, i32) {
    %c0_i32 = arith.constant 0 : i32
    %c0_i32_0 = arith.constant 0 : i32
    %c0_i32_1 = arith.constant 0 : i32
    return %arg0, %c0_i32, %c0_i32_0 : i32, i32, i32
  }
}

</mosaic_0001>

<bundles_post_ra>
// kernel: _lstm_layer.1
= control target key start
LH: loop header
LB: loop body
LE: loop exit
PB: predicated region body
PF: predicated region fallthrough
CT: control target
= control target key end

     0   :  { %s1869_s0 = inlined_call_operand.vmem [shape: f32[2,8,8,128], index: 0, kind: input, shape index: {}]   ;;  %s1870_s1 = inlined_call_operand.vmem [shape: bf16[2,32,128], index: 1, kind: input, shape index: {}]   ;;  %s1871_s2 = inlined_call_operand.hbm [shape: f32[2,8,8,32], index: 2, kind: output, shape index: {0}]   ;;  %s1872_s3 = inlined_call_operand.hbm [shape: f32[2,8,32], index: 3, kind: output, shape index: {1}]   ;;  %s1873_s4 = inlined_call_operand.hbm [shape: f32[2,8,32], index: 4, kind: output, shape index: {2}]  }
   0x1   :  { %1876 = sst [smem:[#allocation12_spill]] %s1869_s0 }
   0x2   :  { %1877 = sst [smem:[#allocation13_spill]] %s1870_s1 }
   0x3   :  { %1878 = sst [smem:[#allocation14_spill]] %s1872_s3 }
   0x4   :  { %10 = vsyncpa [#allocation5], 0 }
   0x5   :  { %12 = vsyncpa [#allocation5 + $0x1], 0 }
   0x6   :  { %13 = vsyncpa [#allocation7], 0 }
   0x7   :  { %15 = vsyncpa [#allocation7 + $0x1], 0  ;;  %s1553_s15 = smov 0   ;;  %s1555_s16 = smov 0  }
   0x8   :  { %s1557_s17 = smov 0   ;;  %s1559_s18 = smov 0  }
   0x9   :  { %s1561_s19 = smov 0   ;;  %s1563_s20 = smov 0  }
   0xa LB: > { %s1179_s21 = sadd.s32 4294967295, %s1520_s20   ;;  %s1874_s22 = sadd.s32 4294967294, %s1520_s20   ;;  %s1520_s20 = sphi %s1563_s20, %s21_s20   ;;  %s1516_s19 = sphi %s1561_s19, %s1891_s19   ;;  %s1512_s18 = sphi %s1559_s18, %s1890_s18   ;;  %s1508_s17 = sphi %s1557_s17, %s1889_s17   ;;  %s1504_s16 = sphi %s1555_s16, %s1888_s16   ;;  %s1500_s15 = sphi %s1553_s15, %s1887_s15  }
   0xb   : > { %s33_s23 = sadd.s32 1, %s1516_s19  ;;  %s112_s24 = sadd.s32 1, %s1508_s17 }
   0xc   : > { %p35_p0 = scmp.ge.s32.totalorder %s33_s23, 2  ;;  %p122_p1 = scmp.ne.s32.totalorder %s1508_s17, %s1504_s16 }
   0xd   : > { %p123_p2 = scmp.eq.s32.totalorder %s1179_s21, 1  ;;  %p128_p3 = scmp.ne.s32.totalorder %s1504_s16, %s1500_s15 }
   0xe   : > { %s1893_s23 = smov (%p35_p0, %s33_s23), 0  ;;  %p129_p5 = scmp.eq.s32.totalorder %s1874_s22, 1 }
   0xf   : > { %1879 = sst [smem:[#allocation11_spill]] %s1893_s23  ;;  %p1595_p4 = por %p123_p2, %p122_p1 }
  0x10   : > { %s107_s26 = ssub.s32 %s1516_s19, %s1893_s23  ;;  %p1183_p6 = scmp.ge.s32.totalorder %s1520_s20, 1 }
  0x11   : > { %p110_p7 = scmp.eq.s32.totalorder %s107_s26, 0  ;;  %p1604_p8 = por %p129_p5, %p128_p3 }
  0x12   : > { %p228_p9 = scmp.lt.s32.totalorder %s1520_s20, 3 }
  0x13   : > { %s1610_s28 = scalar_select %p110_p7, %s1508_s17, %s112_s24  }
  0x14   : > { %p229_p10 = pnand %p1183_p6, %p228_p9 }
  0x15   : > { %s1613_s29 = sand.u32 (!%p229_p10), 1, %s1504_s16   ;;  %p282_p11 = scmp.lt.s32.totalorder (!%p229_p10), %s1512_s18, 1 }
  0x16   : > { %232 = sbr.rel (%p229_p10) target bundleno = 4803 (0x12c3), region = 28  ;;  %s1184_s30 = sshll.u32 (!%p229_p10), %s1613_s29, 6 }
  0x17   : > { %s1185_s5 = sshll.u32 (!%p229_p10), %s1613_s29, 3  ;;  %s1882_s0 = sld [smem:[#allocation12_spill]] (!%p229_p10) }
  0x18   : > { %s1619_s7 = scalar_lea.vmem (!%p229_p10), [#allocation6], %s1185_s5  ;;  %s1623_s10 = scalar_lea.vmem (!%p229_p10), [#allocation8], %s1185_s5 }
  0x19   : > { %s1883_s1 = sld [smem:[#allocation13_spill]] (!%p229_p10)  ;;  %s1637_s22 = scalar_lea.vmem (!%p229_p10), [#allocation4], %s1184_s30 }
  0x1a   : > { %p1191_p12 = scmp.ne.s32.totalorder (!%p229_p10), %s1512_s18, 0 }
  0x1b   : > { %vm310_vm0 = vcmask 261120   ;;  %s283_s6 = scalar_select %p282_p11, %s1512_s18, 1  ;;  %v1522_v0 = vmov 0.0  }
  0x1c   : > { %311 = vst.msk [vmem:[%s1619_s7] sm:$0xff] %vm310_vm0, %v1522_v0  ;;  %316 = sbr.rel (%p1191_p12) target bundleno = 42 (0x2a), region = 36 }
  0x1d   : > { %s1242_s8 = sshll.u32 %s283_s6, 6  ;;  %s1243_s9 = sshll.u32 %s283_s6, 4  ;;  %312 = vst.msk [vmem:[%s1623_s10] sm:$0xff] %vm310_vm0, %v1522_v0 }
  0x1e   : > { %s1630_s13 = scalar_lea.vmem %s1882_s0, %s1242_s8 }
  0x1f   : > { %s1635_s26 = scalar_lea.vmem %s1883_s1, %s1243_s9 }
  0x21   : > { %v317_v1 = vld [vmem:[%s1630_s13] sm:$0xff]  ;;  %v318_v2 = vld [vmem:[%s1630_s13 + $0x8] sm:$0xff]  ;;  %v319_v3 = vld [vmem:[%s1630_s13 + $0x10] sm:$0xff] }
  0x22   : > { %325 = vst [vmem:[#allocation2 + $0x30] sm:$0xff] %v317_v1  ;;  %v320_v4 = vld [vmem:[%s1630_s13 + $0x18] sm:$0xff]  ;;  %v321_v5 = vld [vmem:[%s1630_s13 + $0x20] sm:$0xff]  ;;  %v322_v6 = vld [vmem:[%s1630_s13 + $0x28] sm:$0xff] }
  0x23   : > { %326 = vst [vmem:[#allocation2] sm:$0xff] %v318_v2  ;;  %v323_v7 = vld [vmem:[%s1630_s13 + $0x30] sm:$0xff]  ;;  %v324_v8 = vld [vmem:[%s1630_s13 + $0x38] sm:$0xff] }
  0x24   : > { %327 = vst [vmem:[#allocation2 + $0x18] sm:$0xff] %v319_v3 }
  0x25   : > { %328 = vst [vmem:[#allocation2 + $0x10] sm:$0xff] %v320_v4 }
  0x26   : > { %329 = vst [vmem:[#allocation2 + $0x8] sm:$0xff] %v321_v5 }
  0x27   : > { %330 = vst [vmem:[#allocation2 + $0x20] sm:$0xff] %v322_v6 }
  0x28   : > { %331 = vst [vmem:[#allocation2 + $0x28] sm:$0xff] %v323_v7 }
  0x29   : > { %332 = vst [vmem:[#allocation2 + $0x38] sm:$0xff] %v324_v8 }
  0x2a PF: > { %p1192_p13 = scmp.eq.s32.totalorder %s1512_s18, 0 }
  0x2c   : > { %336 = sbr.rel (%p1192_p13) target bundleno = 58 (0x3a), region = 40 }
  0x31   : > { %v1193_v9 = vld [vmem:[%s1630_s13 + $0x38] sm:$0xff]  ;;  %v1194_v10 = vld [vmem:[%s1630_s13 + $0x30] sm:$0xff]  ;;  %v1195_v11 = vld [vmem:[%s1630_s13 + $0x28] sm:$0xff] }
  0x32   : > { %339 = vst [vmem:[#allocation2 + $0x30] sm:$0xff] %v1193_v9  ;;  %v1196_v12 = vld [vmem:[%s1630_s13 + $0x20] sm:$0xff]  ;;  %v1197_v13 = vld [vmem:[%s1630_s13 + $0x18] sm:$0xff]  ;;  %v1198_v14 = vld [vmem:[%s1630_s13 + $0x10] sm:$0xff] }
  0x33   : > { %343 = vst [vmem:[#allocation2] sm:$0xff] %v1194_v10  ;;  %v1199_v15 = vld [vmem:[%s1630_s13 + $0x8] sm:$0xff]  ;;  %v364_v16 = vld [vmem:[%s1630_s13] sm:$0xff] }
  0x34   : > { %347 = vst [vmem:[#allocation2 + $0x18] sm:$0xff] %v1195_v11 }
  0x35   : > { %351 = vst [vmem:[#allocation2 + $0x10] sm:$0xff] %v1196_v12 }
  0x36   : > { %355 = vst [vmem:[#allocation2 + $0x8] sm:$0xff] %v1197_v13 }
  0x37   : > { %359 = vst [vmem:[#allocation2 + $0x20] sm:$0xff] %v1198_v14 }
  0x38   : > { %363 = vst [vmem:[#allocation2 + $0x28] sm:$0xff] %v1199_v15 }
  0x39   : > { %366 = vst [vmem:[#allocation2 + $0x38] sm:$0xff] %v364_v16 }
  0x3a PF: > { %v1245_v17 = vld [vmem:[%s1635_s26 + $0x8] sm:$0xff]  ;;  %v1244_v18 = vld [vmem:[%s1635_s26] sm:$0xff]  ;;  %v373_v21 = vld [vmem:[#allocation2 + $0x30] sm:$0xff]  ;;  %s1523_s30 = smov 32   ;;  %s1524_s5 = smov 64  }
  0x3b   : > { %397 = vmatpush.bf16.msra.mxu0 %v1245_v17  ;;  %v371_v19 = vld [vmem:[%s1619_s7] sm:$0xff]  ;;  %466 = vmatpush.bf16.msra.mxu1 %v1245_v17  ;;  %v372_v26 = vld [vmem:[%s1623_s10] sm:$0xff]  ;;  %s1525_s6 = smov 96  }
  0x3c   : > { %532 = vmatpush.bf16.msra.mxu2 %v1245_v17  ;;  %598 = vmatpush.bf16.msra.mxu3 %v1245_v17  ;;  %v374_v20 = vpack.c.bf16 %v371_v19, %v371_v19  ;;  %v452_v51 = vld [vmem:[#allocation2] sm:$0xff]  ;;  %v518_v15 = vld [vmem:[#allocation2 + $0x18] sm:$0xff] }
  0x3f   : > { %398 = vmatpush.bf16.msra.mxu0 %v1244_v18  ;;  %467 = vmatpush.bf16.msra.mxu1 %v1244_v18 }
  0x40   : > { %533 = vmatpush.bf16.msra.mxu2 %v1244_v18  ;;  %599 = vmatpush.bf16.msra.mxu3 %v1244_v18 }
  0x42   : > { %1208 = vmatmul.msk.bf16.vlgmr.msra.gmra.mxu0 %vm310_vm0, %v374_v20 }
  0x43   : > { %664 = vmatpush.bf16.msrb.mxu0 %v1245_v17  ;;  %730 = vmatpush.bf16.msrb.mxu1 %v1245_v17 }
  0x44   : > { %796 = vmatpush.bf16.msrb.mxu2 %v1245_v17  ;;  %862 = vmatpush.bf16.msrb.mxu3 %v1245_v17 }
  0x47   : > { %665 = vmatpush.bf16.msrb.mxu0 %v1244_v18  ;;  %731 = vmatpush.bf16.msrb.mxu1 %v1244_v18 }
  0x48   : > { %797 = vmatpush.bf16.msrb.mxu2 %v1244_v18  ;;  %863 = vmatpush.bf16.msrb.mxu3 %v1244_v18 }
  0xbf   : > { %v400_v22 = vpop.f32.mrf.mxu0 }
  0xc0   : > { %v404_v23 = vadd.f32 %v400_v22, %v373_v21 }
  0xc2   : > { %1318 = vtanh.f32 %v404_v23  ;;  %v1209_v27 = vmul.f32 -1.442695, %v404_v23 }
  0xc4   : > { %1320 = vpow2.f32 %v1209_v27 }
  0xc7   : > { %v402_v24 = vpop.f32.mrf.mxu0 }
  0xc8   : > { %v1319_v25 = vpop.eup %1318 }
  0xc9   : > { %431 = vrot.lane.b32.xlu0 %v1319_v25, %s1523_s30 }
  0xca   : > { %v1321_v28 = vpop.eup %1320 }
  0xcb   : > { %v408_v29 = vadd.f32 1.0, %v1321_v28 }
  0xcd   : > { %1322 = vrcp.f32 %v408_v29  ;;  %v420_v35 = vand.u32 2147483648, %v408_v29  ;;  %vm414_vm2 = vweird.f32 %v408_v29  ;;  %v418_v36 = vand.u32 2147483647, %v408_v29 }
  0xcf   : > { %v421_v38 = vor.u32 1.1754944e-38, %v420_v35  ;;  %vm419_vm4 = vcmp.eq.f32.partialorder %v418_v36, 8.507059e+37 }
  0xd1   : > { %426 = vrot.lane.b32.xlu0 %v372_v26, %s1523_s30 }
  0xd3   : > { %v1323_v30 = vpop.eup %1322 }
  0xd4   : > { %v410_v31 = vmul.f32 %v1323_v30, %v408_v29  ;;  %vm415_vm1 = vweird.f32 %v1323_v30 }
  0xd5   : > { %vm416_vm3 = vmor %vm414_vm2, %vm415_vm1 }
  0xd6   : > { %v411_v32 = vsub.f32 1.0, %v410_v31 }
  0xd8   : > { %v412_v33 = vmul.f32 %v1323_v30, %v411_v32 }
  0xda   : > { %v413_v34 = vadd.f32 %v1323_v30, %v412_v33 }
  0xdc   : > { %v417_v37 = vsel %vm416_vm3, %v1323_v30, %v413_v34 }
  0xdd   : > { %v422_v40 = vsel %vm419_vm4, %v421_v38, %v417_v37 }
 0x13b   : > { %v432_v39 = vpop.permute.xlu0 %431 }
 0x13c   : > { %v434_v41 = vmul.f32 %v432_v39, %v422_v40 }
 0x13e   : > { %436 = vrot.lane.b32.xlu1 %v434_v41, %s1523_s30 }
 0x143   : > { %v427_v42 = vpop.permute.xlu0 %426 }
 0x144   : > { %v429_v43 = vmul.f32 %v427_v42, %v422_v40 }
 0x1b0   : > { %v437_v44 = vpop.permute.xlu1 %436 }
 0x1b1   : > { %v439_v45 = vadd.f32 %v437_v44, %v429_v43  ;;  %v584_v43 = vld [vmem:[#allocation2 + $0x10] sm:$0xff] }
 0x1b3   : > { %1324 = vtanh.f32 %v439_v45 }
 0x1b9   : > { %v1325_v46 = vpop.eup %1324 }
 0x1ba   : > { %442 = vrot.lane.b32.xlu1 %v1325_v46, %s1523_s30 }
 0x22c   : > { %v443_v47 = vpop.permute.xlu1 %442 }
 0x22d   : > { %v1670_v48 = vmul.f32 %v443_v47, %v422_v40 }
 0x22f   : > { %v453_v49 = vpack.c.bf16 %v1670_v48, %v1670_v48 }
 0x231   : > { %455 = vrot.lane.b32.xlu2 %v453_v49, %s1524_s5 }
 0x28b   : > { %v456_v50 = vpop.permute.xlu2 %455 }
 0x28c   : > { %1210 = vmatmul.msk.bf16.vlgmr.msra.gmra.mxu1 %vm310_vm0, %v456_v50 }
 0x309   : > { %v469_v52 = vpop.f32.mrf.mxu1 }
 0x30a   : > { %v473_v53 = vadd.f32 %v469_v52, %v452_v51 }
 0x30c   : > { %1326 = vtanh.f32 %v473_v53  ;;  %v1211_v56 = vmul.f32 -1.442695, %v473_v53 }
 0x30e   : > { %1328 = vpow2.f32 %v1211_v56 }
 0x311   : > { %v471_v54 = vpop.f32.mrf.mxu1 }
 0x312   : > { %v1327_v55 = vpop.eup %1326 }
 0x313   : > { %496 = vrot.lane.b32.xlu2 %v1327_v55, %s1523_s30 }
 0x314   : > { %v1329_v57 = vpop.eup %1328 }
 0x315   : > { %v477_v58 = vadd.f32 1.0, %v1329_v57 }
 0x317   : > { %1330 = vrcp.f32 %v477_v58  ;;  %v489_v0 = vand.u32 2147483648, %v477_v58  ;;  %vm483_vm6 = vweird.f32 %v477_v58  ;;  %v487_v1 = vand.u32 2147483647, %v477_v58 }
 0x319   : > { %v490_v3 = vor.u32 1.1754944e-38, %v489_v0  ;;  %vm488_vm8 = vcmp.eq.f32.partialorder %v487_v1, 8.507059e+37 }
 0x31d   : > { %v1331_v59 = vpop.eup %1330 }
 0x31e   : > { %v479_v60 = vmul.f32 %v1331_v59, %v477_v58  ;;  %vm484_vm5 = vweird.f32 %v1331_v59 }
 0x31f   : > { %vm485_vm7 = vmor %vm483_vm6, %vm484_vm5 }
 0x320   : > { %v480_v61 = vsub.f32 1.0, %v479_v60 }
 0x322   : > { %v481_v62 = vmul.f32 %v1331_v59, %v480_v61 }
 0x324   : > { %v482_v63 = vadd.f32 %v1331_v59, %v481_v62 }
 0x326   : > { %v486_v2 = vsel %vm485_vm7, %v1331_v59, %v482_v63 }
 0x327   : > { %v491_v5 = vsel %vm488_vm8, %v490_v3, %v486_v2 }
 0x328   : > { %v494_v7 = vmul.f32 %v491_v5, %v439_v45 }
 0x36d   : > { %v497_v4 = vpop.permute.xlu2 %496 }
 0x36e   : > { %v499_v6 = vmul.f32 %v497_v4, %v491_v5 }
 0x370   : > { %501 = vrot.lane.b32.xlu0 %v499_v6, %s1523_s30 }
 0x3e2   : > { %v502_v8 = vpop.permute.xlu0 %501 }
 0x3e3   : > { %v504_v9 = vadd.f32 %v502_v8, %v494_v7  ;;  %v650_v8 = vld [vmem:[#allocation2 + $0x8] sm:$0xff] }
 0x3e5   : > { %1332 = vtanh.f32 %v504_v9 }
 0x3eb   : > { %v1333_v10 = vpop.eup %1332 }
 0x3ec   : > { %507 = vrot.lane.b32.xlu1 %v1333_v10, %s1523_s30 }
 0x45e   : > { %v508_v11 = vpop.permute.xlu1 %507 }
 0x45f   : > { %v1679_v12 = vmul.f32 %v508_v11, %v491_v5 }
 0x461   : > { %v519_v13 = vpack.c.bf16 %v1679_v12, %v1679_v12 }
 0x463   : > { %521 = vrot.lane.b32.xlu2 %v519_v13, %s1524_s5 }
 0x4bd   : > { %v522_v14 = vpop.permute.xlu2 %521 }
 0x4be   : > { %1212 = vmatmul.msk.bf16.vlgmr.msra.gmra.mxu2 %vm310_vm0, %v522_v14 }
 0x541   : > { %v535_v16 = vpop.f32.mrf.mxu2 }
 0x542   : > { %v539_v17 = vadd.f32 %v535_v16, %v518_v15 }
 0x544   : > { %1334 = vtanh.f32 %v539_v17  ;;  %v1213_v20 = vmul.f32 -1.442695, %v539_v17 }
 0x546   : > { %1336 = vpow2.f32 %v1213_v20 }
 0x549   : > { %v537_v18 = vpop.f32.mrf.mxu2 }
 0x54a   : > { %v1335_v19 = vpop.eup %1334 }
 0x54b   : > { %562 = vrot.lane.b32.xlu0 %v1335_v19, %s1523_s30 }
 0x54c   : > { %v1337_v21 = vpop.eup %1336 }
 0x54d   : > { %v543_v22 = vadd.f32 1.0, %v1337_v21 }
 0x54f   : > { %1338 = vrcp.f32 %v543_v22  ;;  %v555_v28 = vand.u32 2147483648, %v543_v22  ;;  %vm549_vm10 = vweird.f32 %v543_v22  ;;  %v553_v29 = vand.u32 2147483647, %v543_v22 }
 0x551   : > { %v556_v31 = vor.u32 1.1754944e-38, %v555_v28  ;;  %vm554_vm12 = vcmp.eq.f32.partialorder %v553_v29, 8.507059e+37 }
 0x555   : > { %v1339_v23 = vpop.eup %1338 }
 0x556   : > { %v545_v24 = vmul.f32 %v1339_v23, %v543_v22  ;;  %vm550_vm9 = vweird.f32 %v1339_v23 }
 0x557   : > { %vm551_vm11 = vmor %vm549_vm10, %vm550_vm9 }
 0x558   : > { %v546_v25 = vsub.f32 1.0, %v545_v24 }
 0x55a   : > { %v547_v26 = vmul.f32 %v1339_v23, %v546_v25 }
 0x55c   : > { %v548_v27 = vadd.f32 %v1339_v23, %v547_v26 }
 0x55e   : > { %v552_v30 = vsel %vm551_vm11, %v1339_v23, %v548_v27 }
 0x55f   : > { %v557_v33 = vsel %vm554_vm12, %v556_v31, %v552_v30 }
 0x560   : > { %v560_v35 = vmul.f32 %v557_v33, %v504_v9 }
 0x5bd   : > { %v563_v32 = vpop.permute.xlu0 %562 }
 0x5be   : > { %v565_v34 = vmul.f32 %v563_v32, %v557_v33 }
 0x5c0   : > { %567 = vrot.lane.b32.xlu1 %v565_v34, %s1523_s30 }
 0x632   : > { %v568_v36 = vpop.permute.xlu1 %567 }
 0x633   : > { %v570_v37 = vadd.f32 %v568_v36, %v560_v35 }
 0x635   : > { %1340 = vtanh.f32 %v570_v37 }
 0x63b   : > { %v1341_v38 = vpop.eup %1340 }
 0x63c   : > { %573 = vrot.lane.b32.xlu2 %v1341_v38, %s1523_s30 }
 0x696   : > { %v574_v39 = vpop.permute.xlu2 %573 }
 0x697   : > { %v1688_v40 = vmul.f32 %v574_v39, %v557_v33 }
 0x699   : > { %v585_v41 = vpack.c.bf16 %v1688_v40, %v1688_v40 }
 0x69b   : > { %587 = vrot.lane.b32.xlu0 %v585_v41, %s1524_s5 }
 0x70d   : > { %v588_v42 = vpop.permute.xlu0 %587 }
 0x70e   : > { %1214 = vmatmul.msk.bf16.vlgmr.msra.gmra.mxu3 %vm310_vm0, %v588_v42 }
 0x791   : > { %v601_v44 = vpop.f32.mrf.mxu3 }
 0x792   : > { %v605_v45 = vadd.f32 %v601_v44, %v584_v43 }
 0x794   : > { %1342 = vtanh.f32 %v605_v45  ;;  %v1215_v49 = vmul.f32 -1.442695, %v605_v45 }
 0x796   : > { %1344 = vpow2.f32 %v1215_v49 }
 0x799   : > { %v603_v46 = vpop.f32.mrf.mxu3 }
 0x79a   : > { %v1343_v47 = vpop.eup %1342 }
 0x79b   : > { %628 = vrot.lane.b32.xlu1 %v1343_v47, %s1523_s30 }
 0x79c   : > { %v1345_v50 = vpop.eup %1344 }
 0x79d   : > { %v609_v51 = vadd.f32 1.0, %v1345_v50 }
 0x79f   : > { %1346 = vrcp.f32 %v609_v51  ;;  %v621_v57 = vand.u32 2147483648, %v609_v51  ;;  %vm615_vm14 = vweird.f32 %v609_v51  ;;  %v619_v58 = vand.u32 2147483647, %v609_v51 }
 0x7a1   : > { %v622_v60 = vor.u32 1.1754944e-38, %v621_v57  ;;  %vm620_vm1 = vcmp.eq.f32.partialorder %v619_v58, 8.507059e+37 }
 0x7a5   : > { %v1347_v52 = vpop.eup %1346 }
 0x7a6   : > { %v611_v53 = vmul.f32 %v1347_v52, %v609_v51  ;;  %vm616_vm13 = vweird.f32 %v1347_v52 }
 0x7a7   : > { %vm617_vm15 = vmor %vm615_vm14, %vm616_vm13 }
 0x7a8   : > { %v612_v54 = vsub.f32 1.0, %v611_v53 }
 0x7aa   : > { %v613_v55 = vmul.f32 %v1347_v52, %v612_v54 }
 0x7ac   : > { %v614_v56 = vadd.f32 %v1347_v52, %v613_v55 }
 0x7ae   : > { %v618_v59 = vsel %vm617_vm15, %v1347_v52, %v614_v56 }
 0x7af   : > { %v623_v62 = vsel %vm620_vm1, %v622_v60, %v618_v59 }
 0x7b0   : > { %v626_v0 = vmul.f32 %v623_v62, %v570_v37  ;;  %v716_v37 = vld [vmem:[#allocation2 + $0x20] sm:$0xff] }
 0x80d   : > { %v629_v61 = vpop.permute.xlu1 %628 }
 0x80e   : > { %v631_v63 = vmul.f32 %v629_v61, %v623_v62 }
 0x810   : > { %633 = vrot.lane.b32.xlu2 %v631_v63, %s1523_s30 }
 0x86a   : > { %v634_v1 = vpop.permute.xlu2 %633 }
 0x86b   : > { %v636_v2 = vadd.f32 %v634_v1, %v626_v0 }
 0x86d   : > { %1348 = vtanh.f32 %v636_v2 }
 0x873   : > { %v1349_v3 = vpop.eup %1348 }
 0x874   : > { %639 = vrot.lane.b32.xlu0 %v1349_v3, %s1523_s30  ;;  %v782_v3 = vld [vmem:[#allocation2 + $0x28] sm:$0xff] }
 0x8e6   : > { %v640_v4 = vpop.permute.xlu0 %639 }
 0x8e7   : > { %v1697_v5 = vmul.f32 %v640_v4, %v623_v62 }
 0x8e9   : > { %v651_v6 = vpack.c.bf16 %v1697_v5, %v1697_v5 }
 0x8eb   : > { %653 = vrot.lane.b32.xlu1 %v651_v6, %s1524_s5 }
 0x95d   : > { %v654_v7 = vpop.permute.xlu1 %653 }
 0x95e   : > { %1216 = vmatmul.msk.bf16.vlgmr.msrb.gmra.mxu0 %vm310_vm0, %v654_v7 }
 0x9db   : > { %v667_v9 = vpop.f32.mrf.mxu0 }
 0x9dc   : > { %v671_v10 = vadd.f32 %v667_v9, %v650_v8 }
 0x9de   : > { %1350 = vtanh.f32 %v671_v10  ;;  %v1217_v14 = vmul.f32 -1.442695, %v671_v10 }
 0x9e0   : > { %1352 = vpow2.f32 %v1217_v14 }
 0x9e3   : > { %v669_v11 = vpop.f32.mrf.mxu0 }
 0x9e4   : > { %v1351_v13 = vpop.eup %1350 }
 0x9e5   : > { %694 = vrot.lane.b32.xlu2 %v1351_v13, %s1523_s30 }
 0x9e6   : > { %v1353_v15 = vpop.eup %1352 }
 0x9e7   : > { %v675_v16 = vadd.f32 1.0, %v1353_v15 }
 0x9e9   : > { %1354 = vrcp.f32 %v675_v16  ;;  %v687_v22 = vand.u32 2147483648, %v675_v16  ;;  %vm681_vm3 = vweird.f32 %v675_v16  ;;  %v685_v23 = vand.u32 2147483647, %v675_v16 }
 0x9eb   : > { %v688_v25 = vor.u32 1.1754944e-38, %v687_v22  ;;  %vm686_vm5 = vcmp.eq.f32.partialorder %v685_v23, 8.507059e+37 }
 0x9ef   : > { %v1355_v17 = vpop.eup %1354 }
 0x9f0   : > { %v677_v18 = vmul.f32 %v1355_v17, %v675_v16  ;;  %vm682_vm2 = vweird.f32 %v1355_v17 }
 0x9f1   : > { %vm683_vm4 = vmor %vm681_vm3, %vm682_vm2 }
 0x9f2   : > { %v678_v19 = vsub.f32 1.0, %v677_v18 }
 0x9f4   : > { %v679_v20 = vmul.f32 %v1355_v17, %v678_v19 }
 0x9f6   : > { %v680_v21 = vadd.f32 %v1355_v17, %v679_v20 }
 0x9f8   : > { %v684_v24 = vsel %vm683_vm4, %v1355_v17, %v680_v21 }
 0x9f9   : > { %v689_v27 = vsel %vm686_vm5, %v688_v25, %v684_v24 }
 0x9fa   : > { %v692_v29 = vmul.f32 %v689_v27, %v636_v2 }
 0xa3f   : > { %v695_v26 = vpop.permute.xlu2 %694 }
 0xa40   : > { %v697_v28 = vmul.f32 %v695_v26, %v689_v27 }
 0xa42   : > { %699 = vrot.lane.b32.xlu0 %v697_v28, %s1523_s30 }
 0xab4   : > { %v700_v30 = vpop.permute.xlu0 %699 }
 0xab5   : > { %v702_v31 = vadd.f32 %v700_v30, %v692_v29 }
 0xab7   : > { %1356 = vtanh.f32 %v702_v31 }
 0xabd   : > { %v1357_v32 = vpop.eup %1356 }
 0xabe   : > { %705 = vrot.lane.b32.xlu1 %v1357_v32, %s1523_s30 }
 0xb30   : > { %v706_v33 = vpop.permute.xlu1 %705 }
 0xb31   : > { %v1706_v34 = vmul.f32 %v706_v33, %v689_v27  ;;  %v848_v33 = vld [vmem:[#allocation2 + $0x38] sm:$0xff] }
 0xb33   : > { %v717_v35 = vpack.c.bf16 %v1706_v34, %v1706_v34 }
 0xb35   : > { %719 = vrot.lane.b32.xlu2 %v717_v35, %s1524_s5 }
 0xb8f   : > { %v720_v36 = vpop.permute.xlu2 %719 }
 0xb90   : > { %1218 = vmatmul.msk.bf16.vlgmr.msrb.gmra.mxu1 %vm310_vm0, %v720_v36 }
 0xc0d   : > { %v733_v38 = vpop.f32.mrf.mxu1 }
 0xc0e   : > { %v737_v39 = vadd.f32 %v733_v38, %v716_v37 }
 0xc10   : > { %1358 = vtanh.f32 %v737_v39  ;;  %v1219_v43 = vmul.f32 -1.442695, %v737_v39 }
 0xc12   : > { %1360 = vpow2.f32 %v1219_v43 }
 0xc15   : > { %v735_v41 = vpop.f32.mrf.mxu1 }
 0xc16   : > { %v1359_v42 = vpop.eup %1358 }
 0xc17   : > { %760 = vrot.lane.b32.xlu0 %v1359_v42, %s1523_s30 }
 0xc18   : > { %v1361_v44 = vpop.eup %1360 }
 0xc19   : > { %v741_v45 = vadd.f32 1.0, %v1361_v44 }
 0xc1b   : > { %1362 = vrcp.f32 %v741_v45  ;;  %v753_v52 = vand.u32 2147483648, %v741_v45  ;;  %vm747_vm7 = vweird.f32 %v741_v45  ;;  %v751_v53 = vand.u32 2147483647, %v741_v45 }
 0xc1d   : > { %v754_v55 = vor.u32 1.1754944e-38, %v753_v52  ;;  %vm752_vm9 = vcmp.eq.f32.partialorder %v751_v53, 8.507059e+37 }
 0xc21   : > { %v1363_v46 = vpop.eup %1362 }
 0xc22   : > { %v743_v47 = vmul.f32 %v1363_v46, %v741_v45  ;;  %vm748_vm6 = vweird.f32 %v1363_v46 }
 0xc23   : > { %vm749_vm8 = vmor %vm747_vm7, %vm748_vm6 }
 0xc24   : > { %v744_v49 = vsub.f32 1.0, %v743_v47 }
 0xc26   : > { %v745_v50 = vmul.f32 %v1363_v46, %v744_v49 }
 0xc28   : > { %v746_v51 = vadd.f32 %v1363_v46, %v745_v50 }
 0xc2a   : > { %v750_v54 = vsel %vm749_vm8, %v1363_v46, %v746_v51 }
 0xc2b   : > { %v755_v57 = vsel %vm752_vm9, %v754_v55, %v750_v54 }
 0xc2c   : > { %v758_v59 = vmul.f32 %v755_v57, %v702_v31 }
 0xc89   : > { %v761_v56 = vpop.permute.xlu0 %760 }
 0xc8a   : > { %v763_v58 = vmul.f32 %v761_v56, %v755_v57 }
 0xc8c   : > { %765 = vrot.lane.b32.xlu1 %v763_v58, %s1523_s30 }
 0xcfe   : > { %v766_v60 = vpop.permute.xlu1 %765 }
 0xcff   : > { %v768_v61 = vadd.f32 %v766_v60, %v758_v59 }
 0xd01   : > { %1364 = vtanh.f32 %v768_v61 }
 0xd07   : > { %v1365_v62 = vpop.eup %1364 }
 0xd08   : > { %771 = vrot.lane.b32.xlu2 %v1365_v62, %s1523_s30 }
 0xd62   : > { %v772_v63 = vpop.permute.xlu2 %771 }
 0xd63   : > { %v1715_v0 = vmul.f32 %v772_v63, %v755_v57 }
 0xd65   : > { %v783_v1 = vpack.c.bf16 %v1715_v0, %v1715_v0 }
 0xd67   : > { %785 = vrot.lane.b32.xlu0 %v783_v1, %s1524_s5 }
 0xdd9   : > { %v786_v2 = vpop.permute.xlu0 %785 }
 0xdda   : > { %1220 = vmatmul.msk.bf16.vlgmr.msrb.gmra.mxu2 %vm310_vm0, %v786_v2 }
 0xe5d   : > { %v799_v4 = vpop.f32.mrf.mxu2 }
 0xe5e   : > { %v803_v6 = vadd.f32 %v799_v4, %v782_v3 }
 0xe60   : > { %1366 = vtanh.f32 %v803_v6  ;;  %v1221_v9 = vmul.f32 -1.442695, %v803_v6 }
 0xe62   : > { %1368 = vpow2.f32 %v1221_v9 }
 0xe65   : > { %v801_v7 = vpop.f32.mrf.mxu2 }
 0xe66   : > { %v1367_v8 = vpop.eup %1366 }
 0xe67   : > { %826 = vrot.lane.b32.xlu1 %v1367_v8, %s1523_s30 }
 0xe68   : > { %v1369_v10 = vpop.eup %1368 }
 0xe69   : > { %v807_v11 = vadd.f32 1.0, %v1369_v10 }
 0xe6b   : > { %1370 = vrcp.f32 %v807_v11  ;;  %v819_v18 = vand.u32 2147483648, %v807_v11  ;;  %vm813_vm11 = vweird.f32 %v807_v11  ;;  %v817_v19 = vand.u32 2147483647, %v807_v11 }
 0xe6d   : > { %v820_v21 = vor.u32 1.1754944e-38, %v819_v18  ;;  %vm818_vm13 = vcmp.eq.f32.partialorder %v817_v19, 8.507059e+37 }
 0xe71   : > { %v1371_v13 = vpop.eup %1370 }
 0xe72   : > { %v809_v14 = vmul.f32 %v1371_v13, %v807_v11  ;;  %vm814_vm10 = vweird.f32 %v1371_v13 }
 0xe73   : > { %vm815_vm12 = vmor %vm813_vm11, %vm814_vm10 }
 0xe74   : > { %v810_v15 = vsub.f32 1.0, %v809_v14 }
 0xe76   : > { %v811_v16 = vmul.f32 %v1371_v13, %v810_v15 }
 0xe78   : > { %v812_v17 = vadd.f32 %v1371_v13, %v811_v16 }
 0xe7a   : > { %v816_v20 = vsel %vm815_vm12, %v1371_v13, %v812_v17 }
 0xe7b   : > { %v821_v23 = vsel %vm818_vm13, %v820_v21, %v816_v20 }
 0xe7c   : > { %v824_v25 = vmul.f32 %v821_v23, %v768_v61 }
 0xed9   : > { %v827_v22 = vpop.permute.xlu1 %826 }
 0xeda   : > { %v829_v24 = vmul.f32 %v827_v22, %v821_v23 }
 0xedc   : > { %831 = vrot.lane.b32.xlu2 %v829_v24, %s1523_s30 }
 0xf36   : > { %v832_v26 = vpop.permute.xlu2 %831 }
 0xf37   : > { %v834_v27 = vadd.f32 %v832_v26, %v824_v25 }
 0xf39   : > { %1372 = vtanh.f32 %v834_v27 }
 0xf3f   : > { %v1373_v28 = vpop.eup %1372 }
 0xf40   : > { %837 = vrot.lane.b32.xlu0 %v1373_v28, %s1523_s30 }
 0xfb2   : > { %v838_v29 = vpop.permute.xlu0 %837 }
 0xfb3   : > { %v840_v30 = vmul.f32 %v838_v29, %v821_v23 }
 0xfb5   : > { %v849_v31 = vpack.c.bf16 %v840_v30, %v840_v30 }
 0xfb7   : > { %851 = vrot.lane.b32.xlu1 %v849_v31, %s1524_s5 }
0x1029   : > { %v852_v32 = vpop.permute.xlu1 %851 }
0x102a   : > { %1222 = vmatmul.msk.bf16.vlgmr.msrb.gmra.mxu3 %vm310_vm0, %v852_v32 }
0x10ad   : > { %v865_v35 = vpop.f32.mrf.mxu3 }
0x10ae   : > { %v869_v36 = vadd.f32 %v865_v35, %v848_v33 }
0x10b0   : > { %1374 = vtanh.f32 %v869_v36  ;;  %v1223_v39 = vmul.f32 -1.442695, %v869_v36 }
0x10b2   : > { %1376 = vpow2.f32 %v1223_v39 }
0x10b5   : > { %v867_v37 = vpop.f32.mrf.mxu3 }
0x10b6   : > { %v1375_v38 = vpop.eup %1374 }
0x10b7   : > { %892 = vrot.lane.b32.xlu2 %v1375_v38, %s1523_s30 }
0x10b8   : > { %v1377_v41 = vpop.eup %1376 }
0x10b9   : > { %v873_v42 = vadd.f32 1.0, %v1377_v41 }
0x10bb   : > { %1378 = vrcp.f32 %v873_v42  ;;  %v885_v49 = vand.u32 2147483648, %v873_v42  ;;  %vm879_vm15 = vweird.f32 %v873_v42  ;;  %v883_v50 = vand.u32 2147483647, %v873_v42 }
0x10bd   : > { %v886_v51 = vor.u32 1.1754944e-38, %v885_v49  ;;  %vm884_vm2 = vcmp.eq.f32.partialorder %v883_v50, 8.507059e+37 }
0x10bf   : > { %447 = vrot.lane.b32.xlu2 %v1670_v48, %s1524_s5 }
0x10c1   : > { %v1379_v43 = vpop.eup %1378 }
0x10c2   : > { %v875_v44 = vmul.f32 %v1379_v43, %v873_v42  ;;  %vm880_vm14 = vweird.f32 %v1379_v43 }
0x10c3   : > { %vm881_vm1 = vmor %vm879_vm15, %vm880_vm14 }
0x10c4   : > { %v876_v45 = vsub.f32 1.0, %v875_v44 }
0x10c6   : > { %v877_v46 = vmul.f32 %v1379_v43, %v876_v45 }
0x10c7   : > { %644 = vrot.lane.b32.xlu2 %v1697_v5, %s1524_s5 }
0x10c8   : > { %v878_v47 = vadd.f32 %v1379_v43, %v877_v46 }
0x10ca   : > { %v882_v48 = vsel %vm881_vm1, %v1379_v43, %v878_v47 }
0x10cb   : > { %v887_v52 = vsel %vm884_vm2, %v886_v51, %v882_v48 }
0x10cc   : > { %v890_v57 = vmul.f32 %v887_v52, %v834_v27 }
0x10cf   : > { %842 = vrot.lane.b32.xlu2 %v840_v30, %s1524_s5 }
0x1111   : > { %v893_v5 = vpop.permute.xlu2 %892 }
0x1112   : > { %v895_v53 = vmul.f32 %v893_v5, %v887_v52 }
0x1114   : > { %897 = vrot.lane.b32.xlu0 %v895_v53, %s1523_s30 }
0x1119   : > { %v448_v54 = vpop.permute.xlu2 %447 }
0x111a   : > { %450 = vst.msk [vmem:[#allocation3] sm:$0xff] %vm310_vm0, %v448_v54 }
0x111c   : > { %512 = vrot.lane.b32.xlu0 %v1679_v12, %s1524_s5 }
0x1121   : > { %v645_v55 = vpop.permute.xlu2 %644 }
0x1122   : > { %648 = vst.msk [vmem:[#allocation3 + $0x18] sm:$0xff] %vm310_vm0, %v645_v55 }
0x1124   : > { %710 = vrot.lane.b32.xlu0 %v1706_v34, %s1524_s5 }
0x1129   : > { %v843_v56 = vpop.permute.xlu2 %842 }
0x112a   : > { %846 = vst.msk [vmem:[#allocation3 + $0x30] sm:$0xff] %vm310_vm0, %v843_v56 }
0x1186   : > { %v898_v58 = vpop.permute.xlu0 %897 }
0x1187   : > { %v900_v59 = vadd.f32 %v898_v58, %v890_v57 }
0x1189   : > { %1380 = vtanh.f32 %v900_v59 }
0x118e   : > { %v513_v60 = vpop.permute.xlu0 %512 }
0x118f   : > { %v1381_v61 = vpop.eup %1380  ;;  %516 = vst.msk [vmem:[#allocation3 + $0x8] sm:$0xff] %vm310_vm0, %v513_v60 }
0x1190   : > { %903 = vrot.lane.b32.xlu1 %v1381_v61, %s1523_s30 }
0x1196   : > { %v711_v12 = vpop.permute.xlu0 %710 }
0x1197   : > { %714 = vst.msk [vmem:[#allocation3 + $0x20] sm:$0xff] %vm310_vm0, %v711_v12 }
0x1198   : > { %578 = vrot.lane.b32.xlu1 %v1688_v40, %s1524_s5 }
0x11a0   : > { %776 = vrot.lane.b32.xlu1 %v1715_v0, %s1524_s5 }
0x11a8   : > { %915 = vrot.lane.b32.xlu1 %v900_v59, %s1525_s6 }
0x1202   : > { %v904_v34 = vpop.permute.xlu1 %903 }
0x1203   : > { %v906_v62 = vmul.f32 %v904_v34, %v887_v52 }
0x1205   : > { %908 = vrot.lane.b32.xlu0 %v906_v62, %s1524_s5 }
0x120a   : > { %v579_v63 = vpop.permute.xlu1 %578 }
0x120b   : > { %582 = vst.msk [vmem:[#allocation3 + $0x10] sm:$0xff] %vm310_vm0, %v579_v63 }
0x1212   : > { %v777_v1 = vpop.permute.xlu1 %776 }
0x1213   : > { %780 = vst.msk [vmem:[#allocation3 + $0x28] sm:$0xff] %vm310_vm0, %v777_v1 }
0x121a   : > { %v916_v2 = vpop.permute.xlu1 %915 }
0x121b   : > { %918 = vst.msk [vmem:[%s1623_s10] sm:$0xff] %vm310_vm0, %v916_v2 }
0x1275   : > { %921 = sbr.rel (%p1191_p12) target bundleno = 4739 (0x1283), region = 44 }
0x1277   : > { %v909_v3 = vpop.permute.xlu0 %908 }
0x1278   : > { %912 = vst.msk [vmem:[#allocation3 + $0x38] sm:$0xff] %vm310_vm0, %v909_v3 }
0x1279   : > { %913 = vst.msk [vmem:[%s1619_s7] sm:$0xff] %vm310_vm0, %v909_v3 }
0x127a   : > { %v922_v40 = vld [vmem:[#allocation3] sm:$0xff]  ;;  %v923_v0 = vld [vmem:[#allocation3 + $0x8] sm:$0xff]  ;;  %v924_v4 = vld [vmem:[#allocation3 + $0x10] sm:$0xff] }
0x127b   : > { %930 = vst.msk [vmem:[%s1637_s22] sm:$0xff] %vm310_vm0, %v922_v40  ;;  %v925_v6 = vld [vmem:[#allocation3 + $0x18] sm:$0xff]  ;;  %v926_v7 = vld [vmem:[#allocation3 + $0x20] sm:$0xff]  ;;  %v927_v8 = vld [vmem:[#allocation3 + $0x28] sm:$0xff] }
0x127c   : > { %931 = vst.msk [vmem:[%s1637_s22 + $0x8] sm:$0xff] %vm310_vm0, %v923_v0  ;;  %v928_v9 = vld [vmem:[#allocation3 + $0x30] sm:$0xff] }
0x127d   : > { %932 = vst.msk [vmem:[%s1637_s22 + $0x10] sm:$0xff] %vm310_vm0, %v924_v4 }
0x127e   : > { %933 = vst.msk [vmem:[%s1637_s22 + $0x18] sm:$0xff] %vm310_vm0, %v925_v6 }
0x127f   : > { %934 = vst.msk [vmem:[%s1637_s22 + $0x20] sm:$0xff] %vm310_vm0, %v926_v7  ;;  %v929_v10 = vld [vmem:[#allocation3 + $0x38] sm:$0xff] }
0x1280   : > { %935 = vst.msk [vmem:[%s1637_s22 + $0x28] sm:$0xff] %vm310_vm0, %v927_v8 }
0x1281   : > { %936 = vst.msk [vmem:[%s1637_s22 + $0x30] sm:$0xff] %vm310_vm0, %v928_v9 }
0x1282   : > { %937 = vst.msk [vmem:[%s1637_s22 + $0x38] sm:$0xff] %vm310_vm0, %v929_v10 }
0x1283 PF: > { %940 = sbr.rel (%p1192_p13) target bundleno = 4753 (0x1291), region = 48 }
0x1288   : > { %v941_v11 = vld [vmem:[#allocation3] sm:$0xff]  ;;  %v944_v13 = vld [vmem:[#allocation3 + $0x8] sm:$0xff]  ;;  %v947_v14 = vld [vmem:[#allocation3 + $0x10] sm:$0xff] }
0x1289   : > { %1226 = vst.msk [vmem:[%s1637_s22 + $0x38] sm:$0xff] %vm310_vm0, %v941_v11  ;;  %v950_v15 = vld [vmem:[#allocation3 + $0x18] sm:$0xff]  ;;  %v953_v16 = vld [vmem:[#allocation3 + $0x20] sm:$0xff]  ;;  %v956_v17 = vld [vmem:[#allocation3 + $0x28] sm:$0xff] }
0x128a   : > { %1227 = vst.msk [vmem:[%s1637_s22 + $0x30] sm:$0xff] %vm310_vm0, %v944_v13  ;;  %v959_v18 = vld [vmem:[#allocation3 + $0x30] sm:$0xff]  ;;  %v962_v19 = vld [vmem:[#allocation3 + $0x38] sm:$0xff] }
0x128b   : > { %1228 = vst.msk [vmem:[%s1637_s22 + $0x28] sm:$0xff] %vm310_vm0, %v947_v14 }
0x128c   : > { %1229 = vst.msk [vmem:[%s1637_s22 + $0x20] sm:$0xff] %vm310_vm0, %v950_v15 }
0x128d   : > { %1230 = vst.msk [vmem:[%s1637_s22 + $0x18] sm:$0xff] %vm310_vm0, %v953_v16 }
0x128e   : > { %1231 = vst.msk [vmem:[%s1637_s22 + $0x10] sm:$0xff] %vm310_vm0, %v956_v17 }
0x128f   : > { %1232 = vst.msk [vmem:[%s1637_s22 + $0x8] sm:$0xff] %vm310_vm0, %v959_v18 }
0x1290   : > { %963 = vst.msk [vmem:[%s1637_s22] sm:$0xff] %vm310_vm0, %v962_v19 }
0x1291 PF: > { %s1793_s8 = sand.u32 1, %s1179_s21   ;;  %s1238_s9 = sshll.u32 %s1512_s18, 3 }
0x1292   : > { %s1884_s3 = sld [smem:[#allocation14_spill]]  ;;  %s1010_s14 = sshll.u32 %s1619_s7, 4  ;;  %s1011_s14 = int_to_ptr.vmem [resolvable:$true] %s1010_s14 }
0x1293   : > { %s970_s26 = scalar_lea.sflag [#allocation7], %s1793_s8 }
0x1298   : > { %s1008_s13 = scalar_lea.hbm %s1884_s3, %s1238_s9  ;;  %s1402_s0 = scalar_lea.hbm %s1884_s3, 16 }
0x1299   : > { %s1012_s24 = sshll.u32 %s1008_s13, 4  ;;  %s1013_s24 = int_to_ptr.hbm [resolvable:$true] %s1012_s24 }
0x129a   : > { %s1396_s30 = sshra.s32 %s1013_s24, 4  ;;  %s1397_s30 = int_to_ptr.hbm [resolvable:$true] %s1396_s30 }
0x129b   : > { %s1398_s5 = scalar_lea.hbm %s1397_s30, 8  ;;  %p1403_p3 = scmp.lt.s32.totalorder %s1397_s30, %s1884_s3 }
0x129c   : > { %p1399_p0 = scmp.ne.s32.totalorder %s1397_s30, %s1398_s5  ;;  %p1404_p5 = scmp.lt.s32.totalorder %s1402_s0, %s1398_s5 }
0x129e   : > { %p1400_p1 = pnand %p1399_p0, %p1595_p4  ;;  %p1405_p6 = por %p1404_p5, %p1403_p3 }
0x12a0   : > { %p1401_p2 = pneg %p1400_p1 }
0x12a2   : > { %p1406_p7 = pnand %p1405_p6, %p1401_p2 }
0x12a4   : > { %1409 = shalt.err (!%p1406_p7)
}
0x12a5   : > { %1248 = dma.vmem_to_hbm [thread:$0]  (%p1595_p4), %s1011_s14, 128, %s1013_s24, %s970_s26  }
0x12a6   : > { %s1246_s7 = sshll.u32 %s1512_s18, 6  ;;  %s993_s1 = sshll.u32 %s1637_s22, 4  ;;  %s994_s1 = int_to_ptr.vmem [resolvable:$true] %s993_s1 }
0x12a7   : > { %s992_s13 = scalar_lea.hbm %s1871_s2, %s1246_s7  ;;  %s1022_s5 = scalar_lea.hbm %s1873_s4, %s1238_s9 }
0x12a8   : > { %s995_s0 = sshll.u32 %s992_s13, 4  ;;  %s965_s21 = scalar_lea.sflag [#allocation5], %s1613_s29  ;;  %s996_s0 = int_to_ptr.hbm [resolvable:$true] %s995_s0 }
0x12a9   : > { %s1424_s6 = sshra.s32 %s996_s0, 4  ;;  %s1430_s24 = scalar_lea.hbm %s1871_s2, 128  ;;  %s1425_s6 = int_to_ptr.hbm [resolvable:$true] %s1424_s6 }
0x12aa   : > { %s1426_s3 = scalar_lea.hbm %s1425_s6, 64  ;;  %p1431_p12 = scmp.lt.s32.totalorder %s1425_s6, %s1871_s2 }
0x12ab   : > { %p1427_p9 = scmp.ne.s32.totalorder %s1425_s6, %s1426_s3  ;;  %p1432_p13 = scmp.lt.s32.totalorder %s1430_s24, %s1426_s3 }
0x12ad   : > { %p1428_p10 = pnand %p1427_p9, %p1595_p4  ;;  %p1433_p0 = por %p1432_p13, %p1431_p12 }
0x12af   : > { %p1429_p11 = pneg %p1428_p10 }
0x12b1   : > { %p1434_p1 = pnand %p1433_p0, %p1429_p11 }
0x12b3   : > { %1437 = shalt.err (!%p1434_p1)
}
0x12b4   : > { %s1526_s29 = smov 128   ;;  %s1527_s9 = smov 8  }
0x12b5   : > { %1247 = dma.vmem_to_hbm [thread:$0]  (%p1595_p4), %s994_s1, 1024, %s996_s0, %s965_s21, %s1526_s29, %s1526_s29, %s1527_s9  }
0x12b6   : > { %s1024_s11 = sshll.u32 %s1623_s10, 4  ;;  %s1026_s12 = sshll.u32 %s1022_s5, 4  ;;  %s1025_s11 = int_to_ptr.vmem [resolvable:$true] %s1024_s11  ;;  %s1027_s12 = int_to_ptr.hbm [resolvable:$true] %s1026_s12 }
0x12b7   : > { %s1452_s13 = sshra.s32 %s1027_s12, 4  ;;  %s1458_s6 = scalar_lea.hbm %s1873_s4, 16  ;;  %s1453_s13 = int_to_ptr.hbm [resolvable:$true] %s1452_s13 }
0x12b8   : > { %s1454_s23 = scalar_lea.hbm %s1453_s13, 8  ;;  %p1459_p6 = scmp.lt.s32.totalorder %s1453_s13, %s1873_s4 }
0x12b9   : > { %p1455_p2 = scmp.ne.s32.totalorder %s1453_s13, %s1454_s23  ;;  %p1460_p7 = scmp.lt.s32.totalorder %s1458_s6, %s1454_s23 }
0x12bb   : > { %p1456_p3 = pnand %p1455_p2, %p1595_p4  ;;  %p1461_p9 = por %p1460_p7, %p1459_p6 }
0x12bd   : > { %p1457_p5 = pneg %p1456_p3 }
0x12bf   : > { %p1462_p10 = pnand %p1461_p9, %p1457_p5 }
0x12c1   : > { %1465 = shalt.err (!%p1462_p10)
}
0x12c2   : > { %1249 = dma.vmem_to_hbm [thread:$0]  (%p1595_p4), %s1025_s11, 128, %s1027_s12, %s970_s26  }
0x12c3 PF: > { %p1263_p11 = scmp.ge.s32.totalorder %s1520_s20, 2  ;;  %s1038_s10 = sand.u32 1, %s1500_s15  }
0x12c4   : > { %s1039_s1 = scalar_lea.sflag [#allocation5], %s1038_s10 }
0x12c5   : > { %p1254_p12 = pnand %p1263_p11, %p1604_p8 }
0x12c7   : > { %p1255_p13 = pneg %p1254_p12 }
0x12c9   : > { %1491 = dma.done.wait (%p1255_p13), %s1039_s1, 1024  }
0x12ca   : > { %1493 = vsyncadd (%p1255_p13), %s1039_s1, 4294966272  ;;  %s1885_s0 = sadd.s32 4294967294, %s1520_s20  }
0x12cb   : > { %s1048_s5 = sand.u32 1, %s1885_s0  }
0x12cc   : > { %s1049_s21 = scalar_lea.sflag [#allocation7], %s1048_s5 }
0x12cd   : > { %1495 = dma.done.wait (%p1255_p13), %s1049_s21, 256  }
0x12ce   : > { %1497 = vsyncadd (%p1255_p13), %s1049_s21, 4294967040  ;;  %s21_s20 = sadd.s32 1, %s1520_s20   ;;  %s1886_s25 = sld [smem:[#allocation11_spill]] }
0x12cf   : > { %p18_p4 = scmp.ge.s32.totalorder %s21_s20, 4   ;;  %s1887_s15 = smov %s1504_s16 }
0x12d0   : > { %s1888_s16 = smov %s1508_s17  ;;  %s1889_s17 = smov %s1610_s28 }
0x12d1   : > { %s1890_s18 = smov %s1516_s19  ;;  %20 = sbr.rel (!%p18_p4) target bundleno = 10 (0xa), region = 153 }
0x12d4   : > { %s1891_s19 = smov %s1886_s25 }
0x12d6   :  { %1065 = vsyncpa [#allocation5], 1 }
0x12d7   :  { %1067 = vsyncpa [#allocation5 + $0x1], 1 }
0x12d8   :  { %1068 = vsyncpa [#allocation7], 1 }
0x12d9   :  { %1070 = vsyncpa [#allocation7 + $0x1], 1 }

</bundles_post_ra>
